<compile_context>
chip_gen: v6e
topology: v6e:2x2x1
jax: 0.10.0
libtpu: 0.0.40
codegen_flags: <defaults>
</compile_context>

<pallas_src>
import functools

import jax
import jax.numpy as jnp
from jax.experimental import pallas as pl
from jax.experimental.pallas import tpu as pltpu


def _round_up(x, k):
    return (x + k - 1) // k * k


def _relation_matching_kernel(
    vis_ref,    # (vis_dim, m*tn)   : column i*m*tn + j*tn + q = candidate j of query q
    lang_ref,   # (lang_dim, tn)
    mask_ref,   # (m, tn) f32
    vW1_ref,    # (J, vis_dim)   BN-folded, transposed weights
    vW2_ref,    # (J, J)
    lW1_ref,    # (J, lang_dim)
    lW2_ref,    # (J, J)
    bias_ref,   # (J, 4) f32 columns = [vc1, vc2, lc1, lc2] (BN-folded biases)
    cos_ref,    # (1, tn) f32
    ixs_ref,    # (1, tn) i32
):
    m, tn = mask_ref.shape

    # Hoisted once per grid step (never re-materialized in the candidate loop).
    b = bias_ref[...]
    vc1, vc2, lc1, lc2 = b[:, 0:1], b[:, 1:2], b[:, 2:3], b[:, 3:4]   # (J, 1) columns
    mask_all = mask_ref[...]                                          # (m, tn)

    def embT(xT, w1, c1, w2, c2):
        # Linear + BatchNorm1d(eval, folded) + ReLU (+ Dropout == identity) + Linear + BN,
        # feature-major: (J, din) @ (din, N) -> (J, N).  Accumulation is always f32;
        # operands may be bf16 (dot_dtype) on v6e/v7x.
        h = jnp.dot(w1, xT, preferred_element_type=jnp.float32) + c1
        h = jnp.maximum(h, 0.0)
        return jnp.dot(w2, h.astype(w2.dtype), preferred_element_type=jnp.float32) + c2

    eps2 = jnp.float32(1e-24)   # (F.normalize eps = 1e-12) squared

    # Language branch: one lane-dense (J, tn) tile per grid step.
    lT = embT(lang_ref[...], lW1_ref[...], lc1, lW2_ref[...], lc2)                    # (J, tn)
    inv_l = jax.lax.rsqrt(jnp.maximum(jnp.sum(lT * lT, axis=0, keepdims=True), eps2))  # (1, tn)

    # Visual branch: all m candidates embedded with a single matmul pair.
    vT = embT(vis_ref[...], vW1_ref[...], vc1, vW2_ref[...], vc2)                      # (J, m*tn)

    best = None
    best_ix = None
    # Small static unroll over candidates; every temporary is lane-dense (J, tn) / (1, tn),
    # candidate slices are static 128-aligned lane slices (no strided gathers).
    for j in range(m):
        vj = vT[:, j * tn:(j + 1) * tn]                               # (J, tn)
        dot_j = jnp.sum(vj * lT, axis=0, keepdims=True)               # (1, tn)  <v, l>
        vsq_j = jnp.sum(vj * vj, axis=0, keepdims=True)               # (1, tn)  ||v||^2
        cos_j = dot_j * jax.lax.rsqrt(jnp.maximum(vsq_j, eps2)) * inv_l
        score_j = mask_all[j:j + 1, :] * cos_j                        # (1, tn)
        if j == 0:
            best = score_j
            best_ix = jnp.zeros((1, tn), jnp.int32)
        else:
            upd = score_j > best      # strict '>' keeps the first maximum (torch.max semantics)
            best = jnp.where(upd, score_j, best)
            best_ix = jnp.where(upd, jnp.int32(j), best_ix)

    # Outputs are already lane-dense (1, tn): no relayout, plain unmasked stores.
    cos_ref[...] = best
    ixs_ref[...] = best_ix


@functools.partial(jax.jit, static_argnames=("block_n", "dot_dtype"))
def relation_matching(visual_input, lang_input, masks, params, *,
                      block_n=1024, dot_dtype=jnp.float32):
    """Returns (cossim (n,1) f32, ixs (n,) i32) matching the PyTorch module (eval mode).

    dot_dtype=jnp.bfloat16 is recommended on v6e/v7x (bf16 MXU + halved vis DMA bytes);
    all normalization / max math stays f32 regardless.
    """
    n, m, vis_dim = visual_input.shape
    lang_dim = lang_input.shape[1]

    # Fold the eval-mode BatchNorm affine into the linear layers (host-side, once):
    #   (x @ W + b) * s + t  ==  x @ (W * s) + (b * s + t)
    # and transpose for the feature-major kernel layout.
    vW1 = (params["vW1"] * params["vs1"]).T.astype(dot_dtype)          # (J, vis_dim)
    vc1 = (params["vb1"] * params["vs1"] + params["vt1"]).T            # (J, 1)
    vW2 = (params["vW2"] * params["vs2"]).T.astype(dot_dtype)          # (J, J)
    vc2 = (params["vb2"] * params["vs2"] + params["vt2"]).T
    lW1 = (params["lW1"] * params["ls1"]).T.astype(dot_dtype)          # (J, lang_dim)
    lc1 = (params["lb1"] * params["ls1"] + params["lt1"]).T
    lW2 = (params["lW2"] * params["ls2"]).T.astype(dot_dtype)
    lc2 = (params["lb2"] * params["ls2"] + params["lt2"]).T
    biases = jnp.concatenate([vc1, vc2, lc1, lc2], axis=1).astype(jnp.float32)   # (J, 4)

    # tn queries per grid step, queries on lanes => tn is a multiple of 128.
    tn = min(_round_up(block_n, 128), _round_up(n, 128))
    if n > 256:
        # Keep >= 2 grid blocks when there is enough work so v7x's two TensorCores
        # both get a share (grid axis is "parallel").
        tn = min(tn, _round_up(-(-n // 2), 128))
    n_pad = _round_up(n, tn)
    n_blocks = n_pad // tn
    pad = n_pad - n

    vis = visual_input.astype(dot_dtype)
    lang = lang_input.astype(dot_dtype)
    msk = masks.astype(jnp.float32)
    if pad:
        vis = jnp.pad(vis, ((0, pad), (0, 0), (0, 0)))
        lang = jnp.pad(lang, ((0, pad), (0, 0)))
        msk = jnp.pad(msk, ((0, pad), (0, 0)))   # zero mask -> padded rows give (0, ix=0)

    # Candidate-major, feature-on-sublane layout:
    #   column index = block*(m*tn) + candidate*tn + query
    visT = (vis.reshape(n_blocks, tn, m, vis_dim)
               .transpose(3, 0, 2, 1)
               .reshape(vis_dim, n_blocks * m * tn))
    langT = lang.T                                   # (lang_dim, n_pad)
    mskT = msk.T                                     # (m, n_pad)

    def _const(i):
        return (0, 0)

    in_specs = [
        pl.BlockSpec((vis_dim, m * tn), lambda i: (0, i)),
        pl.BlockSpec((lang_dim, tn), lambda i: (0, i)),
        pl.BlockSpec((m, tn), lambda i: (0, i)),
        pl.BlockSpec(vW1.shape, _const),
        pl.BlockSpec(vW2.shape, _const),
        pl.BlockSpec(lW1.shape, _const),
        pl.BlockSpec(lW2.shape, _const),
        pl.BlockSpec(biases.shape, _const),
    ]
    out_specs = (
        pl.BlockSpec((1, tn), lambda i: (0, i)),
        pl.BlockSpec((1, tn), lambda i: (0, i)),
    )
    out_shape = (
        jax.ShapeDtypeStruct((1, n_pad), jnp.float32),
        jax.ShapeDtypeStruct((1, n_pad), jnp.int32),
    )

    cos, ixs = pl.pallas_call(
        _relation_matching_kernel,
        grid=(n_blocks,),
        in_specs=in_specs,
        out_specs=out_specs,
        out_shape=out_shape,
        compiler_params=pltpu.CompilerParams(dimension_semantics=("parallel",)),
    )(visT, langT, mskT, vW1, vW2, lW1, lW2, biases)

    cos = cos.reshape(n_pad)[:n].reshape(n, 1)
    ixs = ixs.reshape(n_pad)[:n]
    return cos, ixs


def init_params(key, vis_dim, lang_dim, jemb_dim):
    """Deterministic synthetic params. BN in eval mode: y = x*scale + shift."""
    bn_eps = 1e-5
    ks = list(jax.random.split(key, 24))

    def linear(kw, kb, din, dout):
        w = 0.1 * jax.random.normal(kw, (din, dout), jnp.float32)
        b = 0.1 * jax.random.normal(kb, (1, dout), jnp.float32)
        return w, b

    def bn(kg, kb, km, kv, d):
        gamma = 1.0 + 0.1 * jax.random.normal(kg, (1, d), jnp.float32)
        beta = 0.1 * jax.random.normal(kb, (1, d), jnp.float32)
        rmean = 0.1 * jax.random.normal(km, (1, d), jnp.float32)
        rvar = 1.0 + 0.1 * jax.random.uniform(kv, (1, d), dtype=jnp.float32)
        scale = gamma / jnp.sqrt(rvar + bn_eps)
        shift = beta - rmean * scale
        return scale, shift

    p = {}
    p["vW1"], p["vb1"] = linear(ks[0], ks[1], vis_dim, jemb_dim)
    p["vs1"], p["vt1"] = bn(ks[2], ks[3], ks[4], ks[5], jemb_dim)
    p["vW2"], p["vb2"] = linear(ks[6], ks[7], jemb_dim, jemb_dim)
    p["vs2"], p["vt2"] = bn(ks[8], ks[9], ks[10], ks[11], jemb_dim)
    p["lW1"], p["lb1"] = linear(ks[12], ks[13], lang_dim, jemb_dim)
    p["ls1"], p["lt1"] = bn(ks[14], ks[15], ks[16], ks[17], jemb_dim)
    p["lW2"], p["lb2"] = linear(ks[18], ks[19], jemb_dim, jemb_dim)
    p["ls2"], p["lt2"] = bn(ks[20], ks[21], ks[22], ks[23], jemb_dim)
    return p


def reference(visual_input, lang_input, masks, params):
    """Pure-JAX reference mirroring the PyTorch forward (eval mode)."""
    n, m, vis_dim = visual_input.shape
    lang_dim = lang_input.shape[1]

    def emb(x, W1, b1, s1, t1, W2, b2, s2, t2):
        h = x @ W1 + b1
        h = h * s1 + t1
        h = jnp.maximum(h, 0.0)
        h = h @ W2 + b2
        return h * s2 + t2

    vkeys = ["vW1", "vb1", "vs1", "vt1", "vW2", "vb2", "vs2", "vt2"]
    lkeys = ["lW1", "lb1", "ls1", "lt1", "lW2", "lb2", "ls2", "lt2"]

    v = emb(visual_input.reshape(n * m, vis_dim), *[params[k] for k in vkeys])
    l_in = jnp.broadcast_to(lang_input[:, None, :], (n, m, lang_dim)).reshape(n * m, lang_dim)
    l = emb(l_in, *[params[k] for k in lkeys])

    v_n = v / jnp.maximum(jnp.linalg.norm(v, axis=1, keepdims=True), 1e-12)
    l_n = l / jnp.maximum(jnp.linalg.norm(l, axis=1, keepdims=True), 1e-12)
    cos = jnp.sum(v_n * l_n, axis=1).reshape(n, m)
    cos = masks * cos
    return jnp.max(cos, axis=1, keepdims=True), jnp.argmax(cos, axis=1).astype(jnp.int32)


if __name__ == "__main__":
    key = jax.random.PRNGKey(0)
    vis_dim, lang_dim, jemb_dim = 48, 32, 32
    kp, kd = jax.random.split(key)
    params = init_params(kp, vis_dim, lang_dim, jemb_dim)

    # (n, m, block_n): small single-block case and a multi-block + padded case.
    for (n, m, block_n) in [(2, 8, 1024), (300, 8, 256)]:
        k1, k2, k3 = jax.random.split(jax.random.fold_in(kd, n), 3)
        visual_input = jax.random.normal(k1, (n, m, vis_dim), jnp.float32)
        lang_input = jax.random.normal(k2, (n, lang_dim), jnp.float32)
        masks = (jax.random.uniform(k3, (n, m)) > 0.3).astype(jnp.float32)

        cossim, ixs = relation_matching(visual_input, lang_input, masks, params,
                                        block_n=block_n)
        jax.block_until_ready((cossim, ixs))

        ref_cos, ref_ixs = reference(visual_input, lang_input, masks, params)
        assert cossim.shape == (n, 1) and ixs.shape == (n,)
        assert jnp.allclose(cossim, ref_cos, atol=2e-5, rtol=2e-5), (cossim, ref_cos)
        assert jnp.array_equal(ixs.astype(jnp.int32), ref_ixs), (ixs, ref_ixs)

    print("KERNEL_OK")
</pallas_src>

<mosaic_0001>
module attributes {stable_mosaic.version = 11 : i64} {
  func.func @_relation_matching_kernel(%arg0: i32, %arg1: memref<48x1024xf32, #tpu.memory_space<vmem>>, %arg2: memref<32x128xf32, #tpu.memory_space<vmem>>, %arg3: memref<8x128xf32, #tpu.memory_space<vmem>>, %arg4: memref<32x48xf32, #tpu.memory_space<vmem>>, %arg5: memref<32x32xf32, #tpu.memory_space<vmem>>, %arg6: memref<32x32xf32, #tpu.memory_space<vmem>>, %arg7: memref<32x32xf32, #tpu.memory_space<vmem>>, %arg8: memref<32x4xf32, #tpu.memory_space<vmem>>, %arg9: memref<1x128xf32, #tpu.memory_space<vmem>>, %arg10: memref<1x128xi32, #tpu.memory_space<vmem>>) attributes {dimension_semantics = [#tpu.dimension_semantics<parallel>], iteration_bounds = array<i64: 1>, scalar_prefetch = 0 : i64, scratch_operands = 0 : i64, tpu.core_type = #tpu.core_type<tc>, window_params = [{transform_indices = @transform_0, window_bounds = array<i64: 48, 1024>}, {transform_indices = @transform_1, window_bounds = array<i64: 32, 128>}, {transform_indices = @transform_2, window_bounds = array<i64: 8, 128>}, {pipeline_mode = #tpu.pipeline_mode<synchronous>, transform_indices = @transform_3, window_bounds = array<i64: 32, 48>}, {pipeline_mode = #tpu.pipeline_mode<synchronous>, transform_indices = @transform_4, window_bounds = array<i64: 32, 32>}, {pipeline_mode = #tpu.pipeline_mode<synchronous>, transform_indices = @transform_5, window_bounds = array<i64: 32, 32>}, {pipeline_mode = #tpu.pipeline_mode<synchronous>, transform_indices = @transform_6, window_bounds = array<i64: 32, 32>}, {pipeline_mode = #tpu.pipeline_mode<synchronous>, transform_indices = @transform_7, window_bounds = array<i64: 32, 4>}, {transform_indices = @transform_8, window_bounds = array<i64: 1, 128>}, {transform_indices = @transform_9, window_bounds = array<i64: 1, 128>}]} {
    %c0 = arith.constant 0 : index
    %c0_0 = arith.constant 0 : index
    %0 = vector.load %arg8[%c0, %c0_0] : memref<32x4xf32, #tpu.memory_space<vmem>>, vector<32x4xf32>
    %1 = vector.extract_strided_slice %0 {offsets = [0, 0], sizes = [32, 1], strides = [1, 1]} : vector<32x4xf32> to vector<32x1xf32>
    %2 = vector.extract_strided_slice %0 {offsets = [0, 1], sizes = [32, 1], strides = [1, 1]} : vector<32x4xf32> to vector<32x1xf32>
    %3 = vector.extract_strided_slice %0 {offsets = [0, 2], sizes = [32, 1], strides = [1, 1]} : vector<32x4xf32> to vector<32x1xf32>
    %4 = vector.extract_strided_slice %0 {offsets = [0, 3], sizes = [32, 1], strides = [1, 1]} : vector<32x4xf32> to vector<32x1xf32>
    %c0_1 = arith.constant 0 : index
    %c0_2 = arith.constant 0 : index
    %5 = vector.load %arg3[%c0_1, %c0_2] : memref<8x128xf32, #tpu.memory_space<vmem>>, vector<8x128xf32>
    %c0_3 = arith.constant 0 : index
    %c0_4 = arith.constant 0 : index
    %6 = vector.load %arg2[%c0_3, %c0_4] : memref<32x128xf32, #tpu.memory_space<vmem>>, vector<32x128xf32>
    %c0_5 = arith.constant 0 : index
    %c0_6 = arith.constant 0 : index
    %7 = vector.load %arg6[%c0_5, %c0_6] : memref<32x32xf32, #tpu.memory_space<vmem>>, vector<32x32xf32>
    %c0_7 = arith.constant 0 : index
    %c0_8 = arith.constant 0 : index
    %8 = vector.load %arg7[%c0_7, %c0_8] : memref<32x32xf32, #tpu.memory_space<vmem>>, vector<32x32xf32>
    %cst = arith.constant dense<0.000000e+00> : vector<32x128xf32>
    %9 = tpu.matmul %7, %6, %cst {dimension_numbers = #tpu.dot_dimension_numbers<[1], [0], [0], [1], [0, 0, 1, 1], [], []>} : vector<32x32xf32>, vector<32x128xf32>, vector<32x128xf32> -> vector<32x128xf32>
    %10 = vector.broadcast %3 : vector<32x1xf32> to vector<32x128xf32>
    %11 = arith.addf %9, %10 : vector<32x128xf32>
    %cst_9 = arith.constant 0.000000e+00 : f32
    %12 = vector.broadcast %cst_9 : f32 to vector<32x128xf32>
    %13 = arith.maximumf %11, %12 : vector<32x128xf32>
    %cst_10 = arith.constant dense<0.000000e+00> : vector<32x128xf32>
    %14 = tpu.matmul %8, %13, %cst_10 {dimension_numbers = #tpu.dot_dimension_numbers<[1], [0], [0], [1], [0, 0, 1, 1], [], []>} : vector<32x32xf32>, vector<32x128xf32>, vector<32x128xf32> -> vector<32x128xf32>
    %15 = vector.broadcast %4 : vector<32x1xf32> to vector<32x128xf32>
    %16 = arith.addf %14, %15 : vector<32x128xf32>
    %17 = arith.mulf %16, %16 : vector<32x128xf32>
    %cst_11 = arith.constant dense<0.000000e+00> : vector<128xf32>
    %18 = vector.multi_reduction <add>, %17, %cst_11 [0] : vector<32x128xf32> to vector<128xf32>
    %19 = vector.shape_cast %18 : vector<128xf32> to vector<1x128xf32>
    %cst_12 = arith.constant 1.000000e-24 : f32
    %20 = vector.broadcast %cst_12 : f32 to vector<1x128xf32>
    %21 = arith.maximumf %19, %20 : vector<1x128xf32>
    %22 = math.rsqrt %21 : vector<1x128xf32>
    %c0_13 = arith.constant 0 : index
    %c0_14 = arith.constant 0 : index
    %23 = vector.load %arg1[%c0_13, %c0_14] : memref<48x1024xf32, #tpu.memory_space<vmem>>, vector<48x1024xf32>
    %c0_15 = arith.constant 0 : index
    %c0_16 = arith.constant 0 : index
    %24 = vector.load %arg4[%c0_15, %c0_16] : memref<32x48xf32, #tpu.memory_space<vmem>>, vector<32x48xf32>
    %c0_17 = arith.constant 0 : index
    %c0_18 = arith.constant 0 : index
    %25 = vector.load %arg5[%c0_17, %c0_18] : memref<32x32xf32, #tpu.memory_space<vmem>>, vector<32x32xf32>
    %cst_19 = arith.constant dense<0.000000e+00> : vector<32x1024xf32>
    %26 = tpu.matmul %24, %23, %cst_19 {dimension_numbers = #tpu.dot_dimension_numbers<[1], [0], [0], [1], [0, 0, 1, 1], [], []>} : vector<32x48xf32>, vector<48x1024xf32>, vector<32x1024xf32> -> vector<32x1024xf32>
    %27 = vector.broadcast %1 : vector<32x1xf32> to vector<32x1024xf32>
    %28 = arith.addf %26, %27 : vector<32x1024xf32>
    %cst_20 = arith.constant 0.000000e+00 : f32
    %29 = vector.broadcast %cst_20 : f32 to vector<32x1024xf32>
    %30 = arith.maximumf %28, %29 : vector<32x1024xf32>
    %cst_21 = arith.constant dense<0.000000e+00> : vector<32x1024xf32>
    %31 = tpu.matmul %25, %30, %cst_21 {dimension_numbers = #tpu.dot_dimension_numbers<[1], [0], [0], [1], [0, 0, 1, 1], [], []>} : vector<32x32xf32>, vector<32x1024xf32>, vector<32x1024xf32> -> vector<32x1024xf32>
    %32 = vector.broadcast %2 : vector<32x1xf32> to vector<32x1024xf32>
    %33 = arith.addf %31, %32 : vector<32x1024xf32>
    %34 = vector.extract_strided_slice %33 {offsets = [0, 0], sizes = [32, 128], strides = [1, 1]} : vector<32x1024xf32> to vector<32x128xf32>
    %35 = arith.mulf %34, %16 : vector<32x128xf32>
    %cst_22 = arith.constant dense<0.000000e+00> : vector<128xf32>
    %36 = vector.multi_reduction <add>, %35, %cst_22 [0] : vector<32x128xf32> to vector<128xf32>
    %37 = vector.shape_cast %36 : vector<128xf32> to vector<1x128xf32>
    %38 = arith.mulf %34, %34 : vector<32x128xf32>
    %cst_23 = arith.constant dense<0.000000e+00> : vector<128xf32>
    %39 = vector.multi_reduction <add>, %38, %cst_23 [0] : vector<32x128xf32> to vector<128xf32>
    %40 = vector.shape_cast %39 : vector<128xf32> to vector<1x128xf32>
    %cst_24 = arith.constant 1.000000e-24 : f32
    %41 = vector.broadcast %cst_24 : f32 to vector<1x128xf32>
    %42 = arith.maximumf %40, %41 : vector<1x128xf32>
    %43 = math.rsqrt %42 : vector<1x128xf32>
    %44 = arith.mulf %37, %43 : vector<1x128xf32>
    %45 = arith.mulf %44, %22 : vector<1x128xf32>
    %46 = vector.extract_strided_slice %5 {offsets = [0, 0], sizes = [1, 128], strides = [1, 1]} : vector<8x128xf32> to vector<1x128xf32>
    %47 = arith.mulf %46, %45 : vector<1x128xf32>
    %c0_i32 = arith.constant 0 : i32
    %48 = vector.broadcast %c0_i32 : i32 to vector<1x128xi32>
    %49 = vector.extract_strided_slice %33 {offsets = [0, 128], sizes = [32, 128], strides = [1, 1]} : vector<32x1024xf32> to vector<32x128xf32>
    %50 = arith.mulf %49, %16 : vector<32x128xf32>
    %cst_25 = arith.constant dense<0.000000e+00> : vector<128xf32>
    %51 = vector.multi_reduction <add>, %50, %cst_25 [0] : vector<32x128xf32> to vector<128xf32>
    %52 = vector.shape_cast %51 : vector<128xf32> to vector<1x128xf32>
    %53 = arith.mulf %49, %49 : vector<32x128xf32>
    %cst_26 = arith.constant dense<0.000000e+00> : vector<128xf32>
    %54 = vector.multi_reduction <add>, %53, %cst_26 [0] : vector<32x128xf32> to vector<128xf32>
    %55 = vector.shape_cast %54 : vector<128xf32> to vector<1x128xf32>
    %cst_27 = arith.constant 1.000000e-24 : f32
    %56 = vector.broadcast %cst_27 : f32 to vector<1x128xf32>
    %57 = arith.maximumf %55, %56 : vector<1x128xf32>
    %58 = math.rsqrt %57 : vector<1x128xf32>
    %59 = arith.mulf %52, %58 : vector<1x128xf32>
    %60 = arith.mulf %59, %22 : vector<1x128xf32>
    %61 = vector.extract_strided_slice %5 {offsets = [1, 0], sizes = [1, 128], strides = [1, 1]} : vector<8x128xf32> to vector<1x128xf32>
    %62 = arith.mulf %61, %60 : vector<1x128xf32>
    %63 = arith.cmpf ogt, %62, %47 : vector<1x128xf32>
    %64 = arith.select %63, %62, %47 : vector<1x128xi1>, vector<1x128xf32>
    %c1_i32 = arith.constant 1 : i32
    %65 = vector.broadcast %c1_i32 : i32 to vector<1x128xi32>
    %66 = arith.select %63, %65, %48 : vector<1x128xi1>, vector<1x128xi32>
    %67 = vector.extract_strided_slice %33 {offsets = [0, 256], sizes = [32, 128], strides = [1, 1]} : vector<32x1024xf32> to vector<32x128xf32>
    %68 = arith.mulf %67, %16 : vector<32x128xf32>
    %cst_28 = arith.constant dense<0.000000e+00> : vector<128xf32>
    %69 = vector.multi_reduction <add>, %68, %cst_28 [0] : vector<32x128xf32> to vector<128xf32>
    %70 = vector.shape_cast %69 : vector<128xf32> to vector<1x128xf32>
    %71 = arith.mulf %67, %67 : vector<32x128xf32>
    %cst_29 = arith.constant dense<0.000000e+00> : vector<128xf32>
    %72 = vector.multi_reduction <add>, %71, %cst_29 [0] : vector<32x128xf32> to vector<128xf32>
    %73 = vector.shape_cast %72 : vector<128xf32> to vector<1x128xf32>
    %cst_30 = arith.constant 1.000000e-24 : f32
    %74 = vector.broadcast %cst_30 : f32 to vector<1x128xf32>
    %75 = arith.maximumf %73, %74 : vector<1x128xf32>
    %76 = math.rsqrt %75 : vector<1x128xf32>
    %77 = arith.mulf %70, %76 : vector<1x128xf32>
    %78 = arith.mulf %77, %22 : vector<1x128xf32>
    %79 = vector.extract_strided_slice %5 {offsets = [2, 0], sizes = [1, 128], strides = [1, 1]} : vector<8x128xf32> to vector<1x128xf32>
    %80 = arith.mulf %79, %78 : vector<1x128xf32>
    %81 = arith.cmpf ogt, %80, %64 : vector<1x128xf32>
    %82 = arith.select %81, %80, %64 : vector<1x128xi1>, vector<1x128xf32>
    %c2_i32 = arith.constant 2 : i32
    %83 = vector.broadcast %c2_i32 : i32 to vector<1x128xi32>
    %84 = arith.select %81, %83, %66 : vector<1x128xi1>, vector<1x128xi32>
    %85 = vector.extract_strided_slice %33 {offsets = [0, 384], sizes = [32, 128], strides = [1, 1]} : vector<32x1024xf32> to vector<32x128xf32>
    %86 = arith.mulf %85, %16 : vector<32x128xf32>
    %cst_31 = arith.constant dense<0.000000e+00> : vector<128xf32>
    %87 = vector.multi_reduction <add>, %86, %cst_31 [0] : vector<32x128xf32> to vector<128xf32>
    %88 = vector.shape_cast %87 : vector<128xf32> to vector<1x128xf32>
    %89 = arith.mulf %85, %85 : vector<32x128xf32>
    %cst_32 = arith.constant dense<0.000000e+00> : vector<128xf32>
    %90 = vector.multi_reduction <add>, %89, %cst_32 [0] : vector<32x128xf32> to vector<128xf32>
    %91 = vector.shape_cast %90 : vector<128xf32> to vector<1x128xf32>
    %cst_33 = arith.constant 1.000000e-24 : f32
    %92 = vector.broadcast %cst_33 : f32 to vector<1x128xf32>
    %93 = arith.maximumf %91, %92 : vector<1x128xf32>
    %94 = math.rsqrt %93 : vector<1x128xf32>
    %95 = arith.mulf %88, %94 : vector<1x128xf32>
    %96 = arith.mulf %95, %22 : vector<1x128xf32>
    %97 = vector.extract_strided_slice %5 {offsets = [3, 0], sizes = [1, 128], strides = [1, 1]} : vector<8x128xf32> to vector<1x128xf32>
    %98 = arith.mulf %97, %96 : vector<1x128xf32>
    %99 = arith.cmpf ogt, %98, %82 : vector<1x128xf32>
    %100 = arith.select %99, %98, %82 : vector<1x128xi1>, vector<1x128xf32>
    %c3_i32 = arith.constant 3 : i32
    %101 = vector.broadcast %c3_i32 : i32 to vector<1x128xi32>
    %102 = arith.select %99, %101, %84 : vector<1x128xi1>, vector<1x128xi32>
    %103 = vector.extract_strided_slice %33 {offsets = [0, 512], sizes = [32, 128], strides = [1, 1]} : vector<32x1024xf32> to vector<32x128xf32>
    %104 = arith.mulf %103, %16 : vector<32x128xf32>
    %cst_34 = arith.constant dense<0.000000e+00> : vector<128xf32>
    %105 = vector.multi_reduction <add>, %104, %cst_34 [0] : vector<32x128xf32> to vector<128xf32>
    %106 = vector.shape_cast %105 : vector<128xf32> to vector<1x128xf32>
    %107 = arith.mulf %103, %103 : vector<32x128xf32>
    %cst_35 = arith.constant dense<0.000000e+00> : vector<128xf32>
    %108 = vector.multi_reduction <add>, %107, %cst_35 [0] : vector<32x128xf32> to vector<128xf32>
    %109 = vector.shape_cast %108 : vector<128xf32> to vector<1x128xf32>
    %cst_36 = arith.constant 1.000000e-24 : f32
    %110 = vector.broadcast %cst_36 : f32 to vector<1x128xf32>
    %111 = arith.maximumf %109, %110 : vector<1x128xf32>
    %112 = math.rsqrt %111 : vector<1x128xf32>
    %113 = arith.mulf %106, %112 : vector<1x128xf32>
    %114 = arith.mulf %113, %22 : vector<1x128xf32>
    %115 = vector.extract_strided_slice %5 {offsets = [4, 0], sizes = [1, 128], strides = [1, 1]} : vector<8x128xf32> to vector<1x128xf32>
    %116 = arith.mulf %115, %114 : vector<1x128xf32>
    %117 = arith.cmpf ogt, %116, %100 : vector<1x128xf32>
    %118 = arith.select %117, %116, %100 : vector<1x128xi1>, vector<1x128xf32>
    %c4_i32 = arith.constant 4 : i32
    %119 = vector.broadcast %c4_i32 : i32 to vector<1x128xi32>
    %120 = arith.select %117, %119, %102 : vector<1x128xi1>, vector<1x128xi32>
    %121 = vector.extract_strided_slice %33 {offsets = [0, 640], sizes = [32, 128], strides = [1, 1]} : vector<32x1024xf32> to vector<32x128xf32>
    %122 = arith.mulf %121, %16 : vector<32x128xf32>
    %cst_37 = arith.constant dense<0.000000e+00> : vector<128xf32>
    %123 = vector.multi_reduction <add>, %122, %cst_37 [0] : vector<32x128xf32> to vector<128xf32>
    %124 = vector.shape_cast %123 : vector<128xf32> to vector<1x128xf32>
    %125 = arith.mulf %121, %121 : vector<32x128xf32>
    %cst_38 = arith.constant dense<0.000000e+00> : vector<128xf32>
    %126 = vector.multi_reduction <add>, %125, %cst_38 [0] : vector<32x128xf32> to vector<128xf32>
    %127 = vector.shape_cast %126 : vector<128xf32> to vector<1x128xf32>
    %cst_39 = arith.constant 1.000000e-24 : f32
    %128 = vector.broadcast %cst_39 : f32 to vector<1x128xf32>
    %129 = arith.maximumf %127, %128 : vector<1x128xf32>
    %130 = math.rsqrt %129 : vector<1x128xf32>
    %131 = arith.mulf %124, %130 : vector<1x128xf32>
    %132 = arith.mulf %131, %22 : vector<1x128xf32>
    %133 = vector.extract_strided_slice %5 {offsets = [5, 0], sizes = [1, 128], strides = [1, 1]} : vector<8x128xf32> to vector<1x128xf32>
    %134 = arith.mulf %133, %132 : vector<1x128xf32>
    %135 = arith.cmpf ogt, %134, %118 : vector<1x128xf32>
    %136 = arith.select %135, %134, %118 : vector<1x128xi1>, vector<1x128xf32>
    %c5_i32 = arith.constant 5 : i32
    %137 = vector.broadcast %c5_i32 : i32 to vector<1x128xi32>
    %138 = arith.select %135, %137, %120 : vector<1x128xi1>, vector<1x128xi32>
    %139 = vector.extract_strided_slice %33 {offsets = [0, 768], sizes = [32, 128], strides = [1, 1]} : vector<32x1024xf32> to vector<32x128xf32>
    %140 = arith.mulf %139, %16 : vector<32x128xf32>
    %cst_40 = arith.constant dense<0.000000e+00> : vector<128xf32>
    %141 = vector.multi_reduction <add>, %140, %cst_40 [0] : vector<32x128xf32> to vector<128xf32>
    %142 = vector.shape_cast %141 : vector<128xf32> to vector<1x128xf32>
    %143 = arith.mulf %139, %139 : vector<32x128xf32>
    %cst_41 = arith.constant dense<0.000000e+00> : vector<128xf32>
    %144 = vector.multi_reduction <add>, %143, %cst_41 [0] : vector<32x128xf32> to vector<128xf32>
    %145 = vector.shape_cast %144 : vector<128xf32> to vector<1x128xf32>
    %cst_42 = arith.constant 1.000000e-24 : f32
    %146 = vector.broadcast %cst_42 : f32 to vector<1x128xf32>
    %147 = arith.maximumf %145, %146 : vector<1x128xf32>
    %148 = math.rsqrt %147 : vector<1x128xf32>
    %149 = arith.mulf %142, %148 : vector<1x128xf32>
    %150 = arith.mulf %149, %22 : vector<1x128xf32>
    %151 = vector.extract_strided_slice %5 {offsets = [6, 0], sizes = [1, 128], strides = [1, 1]} : vector<8x128xf32> to vector<1x128xf32>
    %152 = arith.mulf %151, %150 : vector<1x128xf32>
    %153 = arith.cmpf ogt, %152, %136 : vector<1x128xf32>
    %154 = arith.select %153, %152, %136 : vector<1x128xi1>, vector<1x128xf32>
    %c6_i32 = arith.constant 6 : i32
    %155 = vector.broadcast %c6_i32 : i32 to vector<1x128xi32>
    %156 = arith.select %153, %155, %138 : vector<1x128xi1>, vector<1x128xi32>
    %157 = vector.extract_strided_slice %33 {offsets = [0, 896], sizes = [32, 128], strides = [1, 1]} : vector<32x1024xf32> to vector<32x128xf32>
    %158 = arith.mulf %157, %16 : vector<32x128xf32>
    %cst_43 = arith.constant dense<0.000000e+00> : vector<128xf32>
    %159 = vector.multi_reduction <add>, %158, %cst_43 [0] : vector<32x128xf32> to vector<128xf32>
    %160 = vector.shape_cast %159 : vector<128xf32> to vector<1x128xf32>
    %161 = arith.mulf %157, %157 : vector<32x128xf32>
    %cst_44 = arith.constant dense<0.000000e+00> : vector<128xf32>
    %162 = vector.multi_reduction <add>, %161, %cst_44 [0] : vector<32x128xf32> to vector<128xf32>
    %163 = vector.shape_cast %162 : vector<128xf32> to vector<1x128xf32>
    %cst_45 = arith.constant 1.000000e-24 : f32
    %164 = vector.broadcast %cst_45 : f32 to vector<1x128xf32>
    %165 = arith.maximumf %163, %164 : vector<1x128xf32>
    %166 = math.rsqrt %165 : vector<1x128xf32>
    %167 = arith.mulf %160, %166 : vector<1x128xf32>
    %168 = arith.mulf %167, %22 : vector<1x128xf32>
    %169 = vector.extract_strided_slice %5 {offsets = [7, 0], sizes = [1, 128], strides = [1, 1]} : vector<8x128xf32> to vector<1x128xf32>
    %170 = arith.mulf %169, %168 : vector<1x128xf32>
    %171 = arith.cmpf ogt, %170, %154 : vector<1x128xf32>
    %172 = arith.select %171, %170, %154 : vector<1x128xi1>, vector<1x128xf32>
    %c7_i32 = arith.constant 7 : i32
    %173 = vector.broadcast %c7_i32 : i32 to vector<1x128xi32>
    %174 = arith.select %171, %173, %156 : vector<1x128xi1>, vector<1x128xi32>
    %c0_46 = arith.constant 0 : index
    %c0_47 = arith.constant 0 : index
    %175 = vector.load %arg9[%c0_46, %c0_47] : memref<1x128xf32, #tpu.memory_space<vmem>>, vector<1x128xf32>
    tpu.vector_store %arg9[%c0_46, %c0_47], %172 {strides = array<i32>} : memref<1x128xf32, #tpu.memory_space<vmem>>, vector<1x128xf32>,
    %c0_48 = arith.constant 0 : index
    %c0_49 = arith.constant 0 : index
    %176 = vector.load %arg10[%c0_48, %c0_49] : memref<1x128xi32, #tpu.memory_space<vmem>>, vector<1x128xi32>
    tpu.vector_store %arg10[%c0_48, %c0_49], %174 {strides = array<i32>} : memref<1x128xi32, #tpu.memory_space<vmem>>, vector<1x128xi32>,
    return
  }
  func.func @transform_0(%arg0: i32) -> (i32, i32) {
    %c0_i32 = arith.constant 0 : i32
    %c0_i32_0 = arith.constant 0 : i32
    return %c0_i32, %arg0 : i32, i32
  }
  func.func @transform_1(%arg0: i32) -> (i32, i32) {
    %c0_i32 = arith.constant 0 : i32
    %c0_i32_0 = arith.constant 0 : i32
    return %c0_i32, %arg0 : i32, i32
  }
  func.func @transform_2(%arg0: i32) -> (i32, i32) {
    %c0_i32 = arith.constant 0 : i32
    %c0_i32_0 = arith.constant 0 : i32
    return %c0_i32, %arg0 : i32, i32
  }
  func.func @transform_3(%arg0: i32) -> (i32, i32) {
    %c0_i32 = arith.constant 0 : i32
    %c0_i32_0 = arith.constant 0 : i32
    %c0_i32_1 = arith.constant 0 : i32
    return %c0_i32, %c0_i32_0 : i32, i32
  }
  func.func @transform_4(%arg0: i32) -> (i32, i32) {
    %c0_i32 = arith.constant 0 : i32
    %c0_i32_0 = arith.constant 0 : i32
    %c0_i32_1 = arith.constant 0 : i32
    return %c0_i32, %c0_i32_0 : i32, i32
  }
  func.func @transform_5(%arg0: i32) -> (i32, i32) {
    %c0_i32 = arith.constant 0 : i32
    %c0_i32_0 = arith.constant 0 : i32
    %c0_i32_1 = arith.constant 0 : i32
    return %c0_i32, %c0_i32_0 : i32, i32
  }
  func.func @transform_6(%arg0: i32) -> (i32, i32) {
    %c0_i32 = arith.constant 0 : i32
    %c0_i32_0 = arith.constant 0 : i32
    %c0_i32_1 = arith.constant 0 : i32
    return %c0_i32, %c0_i32_0 : i32, i32
  }
  func.func @transform_7(%arg0: i32) -> (i32, i32) {
    %c0_i32 = arith.constant 0 : i32
    %c0_i32_0 = arith.constant 0 : i32
    %c0_i32_1 = arith.constant 0 : i32
    return %c0_i32, %c0_i32_0 : i32, i32
  }
  func.func @transform_8(%arg0: i32) -> (i32, i32) {
    %c0_i32 = arith.constant 0 : i32
    %c0_i32_0 = arith.constant 0 : i32
    return %c0_i32, %arg0 : i32, i32
  }
  func.func @transform_9(%arg0: i32) -> (i32, i32) {
    %c0_i32 = arith.constant 0 : i32
    %c0_i32_0 = arith.constant 0 : i32
    return %c0_i32, %arg0 : i32, i32
  }
}

</mosaic_0001>

<bundles_post_ra>
// kernel: relation_matching.1
= control target key start
LH: loop header
LB: loop body
LE: loop exit
PB: predicated region body
PF: predicated region fallthrough
CT: control target
= control target key end

     0   :  { %vm68_vm0 = vcmask 261120   ;;  %v1575_v2 = vmov 2   ;;  %v1576_v20 = vmov 0.0   ;;  %vm370_vm1 = vcmask 392192   ;;  %s2204_s1 = inlined_call_operand.vmem [shape: f32[32,128], index: 1, kind: input, shape index: {}]   ;;  %s2205_s5 = inlined_call_operand.vmem [shape: f32[32,32], index: 5, kind: input, shape index: {}]   ;;  %s2206_s0 = inlined_call_operand.vmem [shape: f32[48,1024], index: 0, kind: input, shape index: {}]   ;;  %s2207_s7 = inlined_call_operand.vmem [shape: f32[32,4], index: 7, kind: input, shape index: {}]   ;;  %s2208_s3 = inlined_call_operand.vmem [shape: f32[32,48], index: 3, kind: input, shape index: {}]   ;;  %s2209_s6 = inlined_call_operand.vmem [shape: f32[32,32], index: 6, kind: input, shape index: {}]   ;;  %s2210_s4 = inlined_call_operand.vmem [shape: f32[32,32], index: 4, kind: input, shape index: {}]   ;;  %s2211_s2 = inlined_call_operand.vmem [shape: f32[8,128], index: 2, kind: input, shape index: {}]   ;;  %s2212_s8 = inlined_call_operand.vmem [shape: f32[1,128], index: 8, kind: output, shape index: {0}]   ;;  %s2213_s9 = inlined_call_operand.vmem [shape: s32[1,128], index: 9, kind: output, shape index: {1}]  }
   0x1   :  { %v39_v0 = vld [vmem:[%s2204_s1 + $0x18] sm:$0xff]  ;;  %v38_v1 = vld [vmem:[%s2204_s1 + $0x10] sm:$0xff]  ;;  %1551 = vset.pattern.permute.xlu1 %v1575_v2  ;;  %1550 = vset.pattern.permute.xlu0 %v1575_v2  ;;  %v40_v3 = vld [vmem:[%s2205_s5] sm:$0xff]  ;;  %v1577_v34 = vmov 0   ;;  %v1578_v44 = vmov 1   ;;  %v1579_v45 = vmov 3  }
   0x2   :  { %1517 = vmatprep.subr.mxu0 %v39_v0  ;;  %v37_v4 = vld [vmem:[%s2204_s1 + $0x8] sm:$0xff]  ;;  %1525 = vmatprep.mubr.msk.f32.mxu0 %vm68_vm0, %v40_v3  ;;  %v36_v5 = vld [vmem:[%s2204_s1] sm:$0xff]  ;;  %v42_v9 = vld [vmem:[%s2205_s5 + $0x10] sm:$0xff] }
   0x3   :  { %1518 = vmatpush3.msra.mxu0 %v39_v0  ;;  %v41_v6 = vld [vmem:[%s2205_s5 + $0x8] sm:$0xff]  ;;  %v338_v8 = vld [vmem:[%s2206_s0 + $0x140] sm:$0xff]  ;;  %v43_v12 = vld [vmem:[%s2205_s5 + $0x18] sm:$0xff] }
   0x4   :  { %1519 = vmatprep.subr.mxu0 %v38_v1  ;;  %v339_v7 = vld [vmem:[%s2206_s0 + $0x148] sm:$0xff]  ;;  %v330_v11 = vld [vmem:[%s2206_s0 + $0x100] sm:$0xff]  ;;  %v1681_v16 = vld [vmem:[%s2207_s7 + $0x18] sm:$0xff] }
   0x5   :  { %1520 = vmatpush3.msra.mxu0 %v38_v1  ;;  %v331_v10 = vld [vmem:[%s2206_s0 + $0x108] sm:$0xff]  ;;  %v322_v14 = vld [vmem:[%s2206_s0 + $0xc0] sm:$0xff]  ;;  %65 = vperm.xlu0 %1550, %v1681_v16   ;;  %v1707_v23 = vld [vmem:[%s2207_s7 + $0x10] sm:$0xff] }
   0x6   :  { %1521 = vmatprep.subr.mxu0 %v37_v4  ;;  %v323_v13 = vld [vmem:[%s2206_s0 + $0xc8] sm:$0xff]  ;;  %v314_v17 = vld [vmem:[%s2206_s0 + $0x80] sm:$0xff]  ;;  %v1764_v37 = vld [vmem:[%s2208_s3 + $0x10] sm:$0xff] }
   0x7   :  { %1522 = vmatpush3.msra.mxu0 %v37_v4  ;;  %v315_v15 = vld [vmem:[%s2206_s0 + $0x88] sm:$0xff]  ;;  %v306_v21 = vld [vmem:[%s2206_s0 + $0x40] sm:$0xff]  ;;  %v1786_v42 = vld [vmem:[%s2208_s3 + $0x18] sm:$0xff] }
   0x8   :  { %1523 = vmatprep.subr.mxu0 %v36_v5  ;;  %v1690_v18 = vld [vmem:[%s2207_s7 + $0x8] sm:$0xff]  ;;  %v298_v24 = vld [vmem:[%s2206_s0] sm:$0xff]  ;;  %v341_v1 = vld [vmem:[%s2206_s0 + $0x158] sm:$0xff] }
   0x9   :  { %1524 = vmatpush3.msra.mxu0 %v36_v5  ;;  %v307_v19 = vld [vmem:[%s2206_s0 + $0x48] sm:$0xff]  ;;  %55 = vperm.xlu1 %1551, %v1690_v18   ;;  %v1715_v25 = vld [vmem:[%s2207_s7] sm:$0xff]  ;;  %v340_v2 = vld [vmem:[%s2206_s0 + $0x150] sm:$0xff] }
   0xa   :  { %1526 = vmatmul.mubr.msk.f32.vlgmr.msra.gmra.mxu0 %vm68_vm0, %v41_v6  ;;  %403 = vmatprep.subr.mxu0 %v339_v7  ;;  %v299_v22 = vld [vmem:[%s2206_s0 + $0x8] sm:$0xff]  ;;  %v1720_v26 = vld [vmem:[%s2208_s3] sm:$0xff]  ;;  %v46_v3 = vld [vmem:[%s2209_s6 + $0x10] sm:$0xff] }
   0xb   :  { %404 = vmatpush1.msra.mxu0 %v338_v8  ;;  %1528 = vmatprep.mubr.msk.f32.mxu0 %vm68_vm0, %v42_v9  ;;  %v343_v27 = vld [vmem:[%s2206_s0 + $0x168] sm:$0xff]  ;;  %v342_v28 = vld [vmem:[%s2206_s0 + $0x160] sm:$0xff]  ;;  %v333_v5 = vld [vmem:[%s2206_s0 + $0x118] sm:$0xff] }
   0xc   :  { %405 = vmatprep.subr.mxu0 %v331_v10  ;;  %60 = vperm.xlu0 %1550, %v1707_v23   ;;  %v335_v29 = vld [vmem:[%s2206_s0 + $0x128] sm:$0xff]  ;;  %v334_v30 = vld [vmem:[%s2206_s0 + $0x120] sm:$0xff]  ;;  %v332_v6 = vld [vmem:[%s2206_s0 + $0x110] sm:$0xff] }
   0xd   :  { %406 = vmatpush1.msra.mxu0 %v330_v11  ;;  %50 = vperm.xlu1 %1551, %v1715_v25   ;;  %v1742_v31 = vld [vmem:[%s2208_s3 + $0x8] sm:$0xff]  ;;  %v326_v33 = vld [vmem:[%s2206_s0 + $0xe0] sm:$0xff]  ;;  %v47_v8 = vld [vmem:[%s2209_s6 + $0x18] sm:$0xff] }
   0xe   :  { %1529 = vmatmul.mubr.msk.f32.gmra.mxu0 %vm68_vm0, %v43_v12  ;;  %407 = vmatprep.subr.mxu0 %v323_v13  ;;  %v327_v32 = vld [vmem:[%s2206_s0 + $0xe8] sm:$0xff]  ;;  %v318_v36 = vld [vmem:[%s2206_s0 + $0xa0] sm:$0xff]  ;;  %v325_v9 = vld [vmem:[%s2206_s0 + $0xd8] sm:$0xff] }
   0xf   :  { %408 = vmatpush1.msra.mxu0 %v322_v14  ;;  %447 = vmatprep.mubr.f32.mxu0 %v1576_v20  ;;  %v319_v35 = vld [vmem:[%s2206_s0 + $0xa8] sm:$0xff]  ;;  %v310_v39 = vld [vmem:[%s2206_s0 + $0x60] sm:$0xff]  ;;  %v324_v11 = vld [vmem:[%s2206_s0 + $0xd0] sm:$0xff] }
  0x10   :  { %409 = vmatprep.subr.mxu0 %v315_v15  ;;  %1552 = vset.pattern.permute.xlu0 %v1577_v34  ;;  %v311_v38 = vld [vmem:[%s2206_s0 + $0x68] sm:$0xff]  ;;  %v302_v41 = vld [vmem:[%s2206_s0 + $0x20] sm:$0xff]  ;;  %v317_v13 = vld [vmem:[%s2206_s0 + $0x98] sm:$0xff] }
  0x11   :  { %410 = vmatpush1.msra.mxu0 %v314_v17  ;;  %1553 = vset.pattern.permute.xlu1 %v1577_v34  ;;  %v303_v40 = vld [vmem:[%s2206_s0 + $0x28] sm:$0xff]  ;;  %v44_v43 = vld [vmem:[%s2209_s6] sm:$0xff]  ;;  %v316_v14 = vld [vmem:[%s2206_s0 + $0x90] sm:$0xff] }
  0x12   :  { %411 = vmatprep.subr.mxu0 %v307_v19  ;;  %367 = vperm.xlu0 %1552, %v1681_v16   ;;  %v45_v0 = vld [vmem:[%s2209_s6 + $0x8] sm:$0xff] }
  0x13   :  { %412 = vmatpush1.msra.mxu0 %v306_v21  ;;  %363 = vperm.xlu1 %1553, %v1707_v23   ;;  %v301_v21 = vld [vmem:[%s2206_s0 + $0x18] sm:$0xff] }
  0x14   :  { %413 = vmatprep.subr.mxu0 %v299_v22  ;;  %1539 = vmatprep.mubr.msk.f32.mxu1 %vm68_vm0, %v44_v43 }
  0x15   :  { %414 = vmatpush1.msra.mxu0 %v298_v24 }
  0x16   :  { %1469 = vmatmul.mubr.msk.f32.vlgmr.msra.gmra.mxu0 %vm370_vm1, %v1720_v26  ;;  %581 = vmatprep.subr.mxu0 %v343_v27 }
  0x17   :  { %453 = vmatprep.mubr.f32.mxu0 %v1576_v20  ;;  %582 = vmatpush1.msra.mxu0 %v342_v28 }
  0x18   :  { %583 = vmatprep.subr.mxu0 %v335_v29  ;;  %355 = vperm.xlu0 %1552, %v1715_v25   ;;  %v345_v29 = vld [vmem:[%s2206_s0 + $0x178] sm:$0xff] }
  0x19   :  { %584 = vmatpush1.msra.mxu0 %v334_v30  ;;  %359 = vperm.xlu1 %1553, %v1690_v18  }
  0x1a   :  { %1470 = vmatmul.mubr.msk.f32.gmra.mxu0 %vm370_vm1, %v1742_v31  ;;  %585 = vmatprep.subr.mxu0 %v327_v32 }
  0x1b   :  { %459 = vmatprep.mubr.f32.mxu0 %v1576_v20  ;;  %586 = vmatpush1.msra.mxu0 %v326_v33  ;;  %v344_v33 = vld [vmem:[%s2206_s0 + $0x170] sm:$0xff] }
  0x1c   :  { %587 = vmatprep.subr.mxu0 %v319_v35  ;;  %1555 = vset.pattern.permute.xlu0 %v1578_v44 }
  0x1d   :  { %588 = vmatpush1.msra.mxu0 %v318_v36  ;;  %1554 = vset.pattern.permute.xlu1 %v1578_v44  ;;  %v336_v44 = vld [vmem:[%s2206_s0 + $0x130] sm:$0xff] }
  0x1e   :  { %1471 = vmatmul.mubr.msk.f32.gmra.mxu0 %vm370_vm1, %v1764_v37  ;;  %589 = vmatprep.subr.mxu0 %v311_v38 }
  0x1f   :  { %465 = vmatprep.mubr.f32.mxu0 %v1576_v20  ;;  %590 = vmatpush1.msra.mxu0 %v310_v39  ;;  %v337_v39 = vld [vmem:[%s2206_s0 + $0x138] sm:$0xff] }
  0x20   :  { %591 = vmatprep.subr.mxu0 %v303_v40  ;;  %772 = vperm.xlu1 %1554, %v1715_v25  }
  0x21   :  { %592 = vmatpush1.msra.mxu0 %v302_v41  ;;  %776 = vperm.xlu0 %1555, %v1690_v18  }
  0x22   :  { %1472 = vmatmul.mubr.msk.f32.gmra.mxu0 %vm370_vm1, %v1786_v42 }
  0x23   :  { %625 = vmatprep.mubr.f32.mxu0 %v1576_v20 }
  0x24   :  { %1556 = vset.pattern.permute.xlu1 %v1579_v45 }
  0x25   :  { %780 = vperm.xlu0 %1555, %v1707_v23   ;;  %171 = vperm.xlu1 %1556, %v1715_v25  }
  0x26   :  { %1477 = vmatmul.mubr.msk.f32.vlgmr.msra.gmra.mxu0 %vm370_vm1, %v1720_v26 }
  0x27   :  { %631 = vmatprep.mubr.f32.mxu0 %v1576_v20 }
  0x29   :  { %784 = vperm.xlu0 %1555, %v1681_v16   ;;  %175 = vperm.xlu1 %1556, %v1690_v18   ;;  %v308_v18 = vld [vmem:[%s2206_s0 + $0x50] sm:$0xff] }
  0x2a   :  { %1478 = vmatmul.mubr.msk.f32.gmra.mxu0 %vm370_vm1, %v1742_v31 }
  0x2b   :  { %637 = vmatprep.mubr.f32.mxu0 %v1576_v20 }
  0x2d   :  { %179 = vperm.xlu1 %1556, %v1707_v23   ;;  %v300_v23 = vld [vmem:[%s2206_s0 + $0x10] sm:$0xff] }
  0x2e   :  { %1479 = vmatmul.mubr.msk.f32.gmra.mxu0 %vm370_vm1, %v1764_v37 }
  0x2f   :  { %643 = vmatprep.mubr.f32.mxu0 %v1576_v20 }
  0x31   :  { %183 = vperm.xlu1 %1556, %v1681_v16   ;;  %v309_v16 = vld [vmem:[%s2206_s0 + $0x58] sm:$0xff] }
  0x32   :  { %1480 = vmatmul.mubr.msk.f32.gmra.mxu0 %vm370_vm1, %v1786_v42 }
  0x33   :  { %863 = vmatprep.mubr.f32.mxu0 %v1576_v20 }
  0x80   :  { %v66_v46 = vpop.permute.xlu0 %65 }
  0x84   :  { %v56_v47 = vpop.permute.xlu1 %55 }
  0x87   :  { %v61_v51 = vpop.permute.xlu0 %60 }
  0x88   :  { %v51_v53 = vpop.permute.xlu1 %50 }
  0x8d   :  { %v1860_v17 = vpop.permute.xlu0 %367 }
  0x8e   :  { %v1845_v10 = vpop.permute.xlu1 %363 }
  0x93   :  { %v1876_v28 = vpop.permute.xlu0 %355 }
  0x94   :  { %v1869_v22 = vpop.permute.xlu1 %359 }
  0xca   :  { %v1527_v48 = vpop.f32.mrf.mxu0 }
  0xcb   :  { %v153_v55 = vadd.f32 %v1527_v48, %v56_v47 }
  0xcc   :  { %v147_v49 = vpop.f32.mrf.mxu0 }
  0xcd   :  { %v148_v58 = vadd.f32 %v147_v49, %v51_v53  ;;  %v167_v60 = vmax.f32 %v153_v55, 0.0 }
  0xce   :  { %v1530_v50 = vpop.f32.mrf.mxu0 }
  0xcf   :  { %v163_v52 = vadd.f32 %v1530_v50, %v66_v46  ;;  %v166_v62 = vmax.f32 %v148_v58, 0.0 }
  0xd0   :  { %v157_v54 = vpop.f32.mrf.mxu0 }
  0xd1   :  { %v169_v56 = vmax.f32 %v163_v52, 0.0  ;;  %v158_v57 = vadd.f32 %v157_v54, %v61_v51  ;;  %v329_v52 = vld [vmem:[%s2206_s0 + $0xf8] sm:$0xff]  ;;  %v328_v54 = vld [vmem:[%s2206_s0 + $0xf0] sm:$0xff] }
  0xd3   :  { %v168_v59 = vmax.f32 %v158_v57, 0.0  ;;  %1531 = vmatprep.subr.mxu1 %v169_v56  ;;  %v321_v57 = vld [vmem:[%s2206_s0 + $0xb8] sm:$0xff] }
  0xd4   :  { %1532 = vmatpush3.msra.mxu1 %v169_v56 }
  0xd5   :  { %1533 = vmatprep.subr.mxu1 %v168_v59 }
  0xd6   :  { %1534 = vmatpush3.msra.mxu1 %v168_v59  ;;  %v1817_v61 = vpop.f32.mrf.mxu0  ;;  %v1919_v59 = vld [vmem:[%s2210_s4] sm:$0xff] }
  0xd7   :  { %1535 = vmatprep.subr.mxu1 %v167_v60  ;;  %v450_v48 = vadd.f32 %v1817_v61, %v1876_v28 }
  0xd8   :  { %1536 = vmatpush3.msra.mxu1 %v167_v60  ;;  %v451_v63 = vpop.f32.mrf.mxu0  ;;  %v320_v60 = vld [vmem:[%s2206_s0 + $0xb0] sm:$0xff] }
  0xd9   :  { %1537 = vmatprep.subr.mxu1 %v166_v62  ;;  %v452_v45 = vadd.f32 %v451_v63, %v1876_v28  ;;  %v739_v56 = vmax.f32 %v450_v48, 0.0  ;;  %v312_v63 = vld [vmem:[%s2206_s0 + $0x70] sm:$0xff] }
  0xda   :  { %1538 = vmatpush3.msra.mxu1 %v166_v62  ;;  %v455_v4 = vpop.f32.mrf.mxu0  ;;  %v313_v62 = vld [vmem:[%s2206_s0 + $0x78] sm:$0xff] }
  0xdb   :  { %1540 = vmatmul.mubr.msk.f32.vlgmr.msra.gmra.mxu1 %vm68_vm0, %v45_v0  ;;  %492 = vmatprep.subr.mxu1 %v341_v1  ;;  %v456_v40 = vadd.f32 %v455_v4, %v1869_v22  ;;  %v740_v53 = vmax.f32 %v452_v45, 0.0  ;;  %v305_v1 = vld [vmem:[%s2206_s0 + $0x38] sm:$0xff] }
  0xdc   :  { %v457_v7 = vpop.f32.mrf.mxu0  ;;  %493 = vmatpush1.msra.mxu1 %v340_v2  ;;  %1542 = vmatprep.mubr.msk.f32.mxu1 %vm68_vm0, %v46_v3  ;;  %v1942_v2 = vld [vmem:[%s2210_s4 + $0x8] sm:$0xff] }
  0xdd   :  { %494 = vmatprep.subr.mxu1 %v333_v5  ;;  %v458_v35 = vadd.f32 %v457_v7, %v1869_v22  ;;  %v747_v51 = vmax.f32 %v456_v40, 0.0  ;;  %v304_v5 = vld [vmem:[%s2206_s0 + $0x30] sm:$0xff] }
  0xde   :  { %v461_v12 = vpop.f32.mrf.mxu0  ;;  %495 = vmatpush1.msra.mxu1 %v332_v6 }
  0xdf   :  { %1543 = vmatmul.mubr.msk.f32.gmra.mxu1 %vm68_vm0, %v47_v8  ;;  %496 = vmatprep.subr.mxu1 %v325_v9  ;;  %v462_v30 = vadd.f32 %v461_v12, %v1845_v10  ;;  %v748_v49 = vmax.f32 %v458_v35, 0.0 }
  0xe0   :  { %v463_v15 = vpop.f32.mrf.mxu0  ;;  %497 = vmatpush1.msra.mxu1 %v324_v11  ;;  %536 = vmatprep.mubr.f32.mxu1 %v1576_v20 }
  0xe1   :  { %498 = vmatprep.subr.mxu1 %v317_v13  ;;  %v464_v25 = vadd.f32 %v463_v15, %v1845_v10  ;;  %v755_v47 = vmax.f32 %v462_v30, 0.0  ;;  %v1962_v13 = vld [vmem:[%s2210_s4 + $0x10] sm:$0xff] }
  0xe2   :  { %v467_v19 = vpop.f32.mrf.mxu0  ;;  %499 = vmatpush1.msra.mxu1 %v316_v14 }
  0xe3   :  { %500 = vmatprep.subr.mxu1 %v309_v16  ;;  %v468_v24 = vadd.f32 %v467_v19, %v1860_v17  ;;  %v756_v43 = vmax.f32 %v464_v25, 0.0 }
  0xe4   :  { %v469_v27 = vpop.f32.mrf.mxu0  ;;  %501 = vmatpush1.msra.mxu1 %v308_v18 }
  0xe5   :  { %v470_v32 = vadd.f32 %v469_v27, %v1860_v17  ;;  %502 = vmatprep.subr.mxu1 %v301_v21  ;;  %v763_v38 = vmax.f32 %v468_v24, 0.0 }
  0xe6   :  { %503 = vmatpush1.msra.mxu1 %v300_v23  ;;  %v1887_v36 = vpop.f32.mrf.mxu0 }
  0xe7   :  { %v764_v41 = vmax.f32 %v470_v32, 0.0  ;;  %1473 = vmatmul.mubr.msk.f32.vlgmr.msra.gmra.mxu1 %vm370_vm1, %v1720_v26  ;;  %670 = vmatprep.subr.mxu1 %v345_v29  ;;  %v628_v19 = vadd.f32 %v1887_v36, %v1876_v28 }
  0xe8   :  { %v1899_v46 = vpop.f32.mrf.mxu0  ;;  %542 = vmatprep.mubr.f32.mxu1 %v1576_v20  ;;  %671 = vmatpush1.msra.mxu1 %v344_v33 }
  0xe9   :  { %823 = vmatprep.subr.mxu0 %v764_v41  ;;  %672 = vmatprep.subr.mxu1 %v337_v39  ;;  %v630_v16 = vadd.f32 %v1899_v46, %v1876_v28  ;;  %v743_v25 = vmax.f32 %v628_v19, 0.0 }
  0xea   :  { %v633_v50 = vpop.f32.mrf.mxu0  ;;  %824 = vmatpush1.msra.mxu0 %v763_v38  ;;  %673 = vmatpush1.msra.mxu1 %v336_v44 }
  0xeb   :  { %1474 = vmatmul.mubr.msk.f32.gmra.mxu1 %vm370_vm1, %v1742_v31  ;;  %825 = vmatprep.subr.mxu0 %v756_v43  ;;  %v634_v11 = vadd.f32 %v633_v50, %v1869_v22  ;;  %v744_v24 = vmax.f32 %v630_v16, 0.0 }
  0xec   :  { %v635_v55 = vpop.f32.mrf.mxu0  ;;  %826 = vmatpush1.msra.mxu0 %v755_v47  ;;  %548 = vmatprep.mubr.f32.mxu1 %v1576_v20 }
  0xed   :  { %827 = vmatprep.subr.mxu0 %v748_v49  ;;  %674 = vmatprep.subr.mxu1 %v329_v52  ;;  %v636_v8 = vadd.f32 %v635_v55, %v1869_v22  ;;  %v751_v23 = vmax.f32 %v634_v11, 0.0 }
  0xee   :  { %v639_v58 = vpop.f32.mrf.mxu0  ;;  %828 = vmatpush1.msra.mxu0 %v747_v51  ;;  %675 = vmatpush1.msra.mxu1 %v328_v54 }
  0xef   :  { %1475 = vmatmul.mubr.msk.f32.gmra.mxu1 %vm370_vm1, %v1764_v37  ;;  %829 = vmatprep.subr.mxu0 %v740_v53  ;;  %v640_v6 = vadd.f32 %v639_v58, %v1845_v10  ;;  %v752_v21 = vmax.f32 %v636_v8, 0.0 }
  0xf0   :  { %v641_v61 = vpop.f32.mrf.mxu0  ;;  %830 = vmatpush1.msra.mxu0 %v739_v56  ;;  %676 = vmatprep.subr.mxu1 %v321_v57  ;;  %v2020_v56 = vpop.permute.xlu0 %776 }
  0xf1   :  { %1485 = vmatmul.mubr.msk.f32.vlgmr.msra.gmra.mxu0 %vm68_vm0, %v1919_v59  ;;  %554 = vmatprep.mubr.f32.mxu1 %v1576_v20  ;;  %v642_v3 = vadd.f32 %v641_v61, %v1845_v10  ;;  %v759_v18 = vmax.f32 %v640_v6, 0.0 }
  0xf2   :  { %v645_v0 = vpop.f32.mrf.mxu0  ;;  %677 = vmatpush1.msra.mxu1 %v320_v60  ;;  %869 = vmatprep.mubr.f32.mxu0 %v1576_v20 }
  0xf3   :  { %v646_v4 = vadd.f32 %v645_v0, %v1860_v17  ;;  %1476 = vmatmul.mubr.msk.f32.gmra.mxu1 %vm370_vm1, %v1786_v42  ;;  %678 = vmatprep.subr.mxu1 %v313_v62  ;;  %v760_v14 = vmax.f32 %v642_v3, 0.0 }
  0xf4   :  { %v647_v7 = vpop.f32.mrf.mxu0  ;;  %679 = vmatpush1.msra.mxu1 %v312_v63  ;;  %714 = vmatprep.mubr.f32.mxu1 %v1576_v20 }
  0xf5   :  { %v648_v9 = vadd.f32 %v647_v7, %v1860_v17  ;;  %680 = vmatprep.subr.mxu1 %v305_v1  ;;  %1486 = vmatmul.mubr.msk.f32.gmra.mxu0 %vm68_vm0, %v1942_v2  ;;  %v767_v12 = vmax.f32 %v646_v4, 0.0 }
  0xf6   :  { %681 = vmatpush1.msra.mxu1 %v304_v5  ;;  %875 = vmatprep.mubr.f32.mxu0 %v1576_v20 }
  0xf7   :  { %v768_v15 = vmax.f32 %v648_v9, 0.0  ;;  %1481 = vmatmul.mubr.msk.f32.vlgmr.msra.gmra.mxu1 %vm370_vm1, %v1720_v26  ;;  %v1977_v26 = vld [vmem:[%s2210_s4 + $0x18] sm:$0xff] }
  0xf8   :  { %720 = vmatprep.mubr.f32.mxu1 %v1576_v20 }
  0xf9   :  { %1487 = vmatmul.mubr.msk.f32.gmra.mxu0 %vm68_vm0, %v1962_v13  ;;  %1001 = vmatprep.subr.mxu0 %v768_v15 }
  0xfa   :  { %1002 = vmatpush1.msra.mxu0 %v767_v12  ;;  %881 = vmatprep.mubr.f32.mxu0 %v1576_v20  ;;  %v2034_v12 = vpop.permute.xlu0 %780 }
  0xfb   :  { %1482 = vmatmul.mubr.msk.f32.gmra.mxu1 %vm370_vm1, %v1742_v31  ;;  %1003 = vmatprep.subr.mxu0 %v760_v14  ;;  %v2002_v31 = vpop.permute.xlu1 %772 }
  0xfc   :  { %1004 = vmatpush1.msra.mxu0 %v759_v18  ;;  %726 = vmatprep.mubr.f32.mxu1 %v1576_v20 }
  0xfd   :  { %1488 = vmatmul.mubr.msk.f32.gmra.mxu0 %vm68_vm0, %v1977_v26  ;;  %1005 = vmatprep.subr.mxu0 %v752_v21 }
  0xfe   :  { %1006 = vmatpush1.msra.mxu0 %v751_v23  ;;  %1041 = vmatprep.mubr.f32.mxu0 %v1576_v20 }
  0xff   :  { %1483 = vmatmul.mubr.msk.f32.gmra.mxu1 %vm370_vm1, %v1764_v37  ;;  %1007 = vmatprep.subr.mxu0 %v744_v24  ;;  %v172_v37 = vpop.permute.xlu1 %171 }
 0x100   :  { %1008 = vmatpush1.msra.mxu0 %v743_v25  ;;  %732 = vmatprep.mubr.f32.mxu1 %v1576_v20 }
 0x101   :  { %1493 = vmatmul.mubr.msk.f32.vlgmr.msra.gmra.mxu0 %vm68_vm0, %v1919_v59 }
 0x102   :  { %1047 = vmatprep.mubr.f32.mxu0 %v1576_v20 }
 0x103   :  { %1484 = vmatmul.mubr.msk.f32.gmra.mxu1 %vm370_vm1, %v1786_v42  ;;  %v176_v27 = vpop.permute.xlu1 %175 }
 0x104   :  { %952 = vmatprep.mubr.f32.mxu1 %v1576_v20 }
 0x105   :  { %1494 = vmatmul.mubr.msk.f32.gmra.mxu0 %vm68_vm0, %v1942_v2 }
 0x106   :  { %1053 = vmatprep.mubr.f32.mxu0 %v1576_v20 }
 0x107   :  { %v180_v42 = vpop.permute.xlu1 %179 }
 0x109   :  { %1495 = vmatmul.mubr.msk.f32.gmra.mxu0 %vm68_vm0, %v1962_v13 }
 0x10a   :  { %1059 = vmatprep.mubr.f32.mxu0 %v1576_v20 }
 0x10b   :  { %v184_v33 = vpop.permute.xlu1 %183 }
 0x10d   :  { %1496 = vmatmul.mubr.msk.f32.gmra.mxu0 %vm68_vm0, %v1977_v26 }
 0x19b   :  { %v1541_v29 = vpop.f32.mrf.mxu1 }
 0x19c   :  { %v2004_v30 = vadd.f32 %v1541_v29, %v176_v27 }
 0x19d   :  { %v264_v32 = vpop.f32.mrf.mxu1 }
 0x19e   :  { %v284_v35 = vmul.f32 %v2004_v30, %v2004_v30  ;;  %v2008_v36 = vadd.f32 %v264_v32, %v172_v37 }
 0x19f   :  { %v1544_v38 = vpop.f32.mrf.mxu1 }
 0x1a0   :  { %v283_v39 = vmul.f32 %v2008_v36, %v2008_v36  ;;  %v2012_v40 = vadd.f32 %v1544_v38, %v184_v33 }
 0x1a1   :  { %v274_v41 = vpop.f32.mrf.mxu1 }
 0x1a2   :  { %v287_v43 = vadd.f32 %v284_v35, %v283_v39  ;;  %v2014_v44 = vadd.f32 %v274_v41, %v180_v42  ;;  %v286_v46 = vmul.f32 %v2012_v40, %v2012_v40 }
 0x1a4   :  { %v285_v45 = vmul.f32 %v2014_v44, %v2014_v44 }
 0x1a6   :  { %v288_v47 = vadd.f32 %v287_v43, %v285_v45 }
 0x1a7   :  { %v538_v48 = vpop.f32.mrf.mxu1 }
 0x1a8   :  { %v289_v49 = vadd.f32 %v288_v47, %v286_v46  ;;  %v2024_v1 = vadd.f32 %v538_v48, %v1876_v28 }
 0x1a9   :  { %v540_v50 = vpop.f32.mrf.mxu1 }
 0x1aa   :  { %v290_v51 = vrot.slane %v289_v49, 4  ;;  %v2027_v3 = vadd.f32 %v540_v50, %v1876_v28 }
 0x1ab   :  { %v544_v52 = vpop.f32.mrf.mxu1 }
 0x1ac   :  { %v291_v53 = vadd.f32 %v290_v51, %v289_v49  ;;  %v545_v14 = vadd.f32 %v544_v52, %v1869_v22 }
 0x1ad   :  { %v546_v54 = vpop.f32.mrf.mxu1 }
 0x1ae   :  { %v292_v57 = vrot.slane %v291_v53, 2  ;;  %v547_v15 = vadd.f32 %v546_v54, %v1869_v22  ;;  %v2046_v54 = vpop.permute.xlu0 %784 }
 0x1af   :  { %v550_v55 = vpop.f32.mrf.mxu1 }
 0x1b0   :  { %v293_v0 = vadd.f32 %v292_v57, %v291_v53  ;;  %v551_v7 = vadd.f32 %v550_v55, %v1845_v10  ;;  %v750_v51 = vmax.f32 %v547_v15, 0.0  ;;  %v749_v55 = vmax.f32 %v545_v14, 0.0 }
 0x1b1   :  { %v552_v58 = vpop.f32.mrf.mxu1  ;;  %v865_v60 = vpop.f32.mrf.mxu0 }
 0x1b2   :  { %v866_v63 = vadd.f32 %v865_v60, %v2002_v31  ;;  %v553_v8 = vadd.f32 %v552_v58, %v1845_v10  ;;  %v294_v27 = vrot.slane %v293_v0, 1  ;;  %v757_v38 = vmax.f32 %v551_v7, 0.0 }
 0x1b3   :  { %v556_v61 = vpop.f32.mrf.mxu1  ;;  %v867_v62 = vpop.f32.mrf.mxu0 }
 0x1b4   :  { %v557_v4 = vadd.f32 %v556_v61, %v1860_v17  ;;  %v1168_v16 = vmul.f32 %v866_v63, %v866_v63  ;;  %v868_v18 = vadd.f32 %v867_v62, %v2002_v31  ;;  %v1155_v23 = vmul.f32 %v866_v63, %v2008_v36 }
 0x1b5   :  { %v558_v5 = vpop.f32.mrf.mxu1  ;;  %v871_v6 = vpop.f32.mrf.mxu0  ;;  %v758_v39 = vmax.f32 %v553_v8, 0.0  ;;  %v2049_v63 = vadd.f32 %v294_v27, %v293_v0 }
 0x1b6   :  { %v559_v9 = vadd.f32 %v558_v5, %v1860_v17  ;;  %v872_v11 = vadd.f32 %v871_v6, %v2020_v56  ;;  %v765_v42 = vmax.f32 %v557_v4, 0.0  ;;  %v1199_v29 = vmul.f32 %v868_v18, %v868_v18 }
 0x1b7   :  { %v716_v19 = vpop.f32.mrf.mxu1  ;;  %v873_v21 = vpop.f32.mrf.mxu0  ;;  %v1186_v45 = vmul.f32 %v868_v18, %v2008_v36  ;;  %v741_v4 = vmax.f32 %v2024_v1, 0.0  ;;  %v742_v5 = vmax.f32 %v2027_v3, 0.0 }
 0x1b8   :  { %v766_v24 = vmax.f32 %v559_v9, 0.0  ;;  %v1156_v25 = vmul.f32 %v872_v11, %v2004_v30  ;;  %v1169_v37 = vmul.f32 %v872_v11, %v872_v11  ;;  %v874_v32 = vadd.f32 %v873_v21, %v2020_v56 }
 0x1b9   :  { %v718_v33 = vpop.f32.mrf.mxu1  ;;  %v877_v35 = vpop.f32.mrf.mxu0 }
 0x1ba   :  { %v1159_v41 = vadd.f32 %v1156_v25, %v1155_v23  ;;  %v878_v43 = vadd.f32 %v877_v35, %v2034_v12  ;;  %912 = vmatprep.subr.mxu1 %v766_v24  ;;  %v1172_v46 = vadd.f32 %v1169_v37, %v1168_v16  ;;  %v1187_v47 = vmul.f32 %v874_v32, %v2004_v30 }
 0x1bb   :  { %v1200_v48 = vmul.f32 %v874_v32, %v874_v32  ;;  %v722_v49 = vpop.f32.mrf.mxu1  ;;  %v879_v50 = vpop.f32.mrf.mxu0  ;;  %913 = vmatpush1.msra.mxu1 %v765_v42  ;;  %v2056_v16 = vadd.f32 %v716_v19, %v1876_v28 }
 0x1bc   :  { %v1157_v52 = vmul.f32 %v878_v43, %v2014_v44  ;;  %v1170_v53 = vmul.f32 %v878_v43, %v878_v43  ;;  %914 = vmatprep.subr.mxu1 %v758_v39  ;;  %v1190_v57 = vadd.f32 %v1187_v47, %v1186_v45  ;;  %v880_v60 = vadd.f32 %v879_v50, %v2034_v12 }
 0x1bd   :  { %v1203_v58 = vadd.f32 %v1200_v48, %v1199_v29  ;;  %v724_v61 = vpop.f32.mrf.mxu1  ;;  %v883_v62 = vpop.f32.mrf.mxu0  ;;  %915 = vmatpush1.msra.mxu1 %v757_v38  ;;  %v296_v29 = vmax.f32 %v2049_v63, 1e-24  ;;  %v2078_v47 = vadd.f32 %v722_v49, %v1869_v22 }
 0x1be   :  { %v1160_v6 = vadd.f32 %v1159_v41, %v1157_v52  ;;  %916 = vmatprep.subr.mxu1 %v750_v51  ;;  %v1173_v7 = vadd.f32 %v1172_v46, %v1170_v53  ;;  %v1188_v8 = vmul.f32 %v880_v60, %v2014_v44  ;;  %v1201_v9 = vmul.f32 %v880_v60, %v880_v60 }
 0x1bf   :  { %v884_v11 = vadd.f32 %v883_v62, %v2046_v54  ;;  %v728_v14 = vpop.f32.mrf.mxu1  ;;  %v885_v15 = vpop.f32.mrf.mxu0  ;;  %917 = vmatpush1.msra.mxu1 %v749_v55  ;;  %v2059_v0 = vadd.f32 %v724_v61, %v1869_v22  ;;  %v2073_v41 = vadd.f32 %v718_v33, %v1876_v28 }
 0x1c0   :  { %v886_v1 = vadd.f32 %v885_v15, %v2046_v54  ;;  %918 = vmatprep.subr.mxu1 %v742_v5  ;;  %v1191_v3 = vadd.f32 %v1190_v57, %v1188_v8  ;;  %v1204_v18 = vadd.f32 %v1203_v58, %v1201_v9  ;;  %v2064_v37 = vadd.f32 %v728_v14, %v1845_v10 }
 0x1c1   :  { %v1158_v21 = vmul.f32 %v884_v11, %v2012_v40  ;;  %v1171_v23 = vmul.f32 %v884_v11, %v884_v11  ;;  %v730_v24 = vpop.f32.mrf.mxu1  ;;  %919 = vmatpush1.msra.mxu1 %v741_v4  ;;  %v1043_v25 = vpop.f32.mrf.mxu0  ;;  %v754_v48 = vmax.f32 %v2059_v0, 0.0 }
 0x1c2   :  { %v1189_v19 = vmul.f32 %v886_v1, %v2012_v40  ;;  %v1202_v27 = vmul.f32 %v886_v1, %v886_v1  ;;  %v731_v42 = vadd.f32 %v730_v24, %v1845_v10  ;;  %1489 = vmatmul.mubr.msk.f32.vlgmr.msra.gmra.mxu1 %vm68_vm0, %v1919_v59  ;;  %v1044_v46 = vadd.f32 %v1043_v25, %v2002_v31 }
 0x1c3   :  { %v1161_v32 = vadd.f32 %v1160_v6, %v1158_v21  ;;  %v1174_v35 = vadd.f32 %v1173_v7, %v1171_v23  ;;  %v734_v38 = vpop.f32.mrf.mxu1  ;;  %v1045_v39 = vpop.f32.mrf.mxu0  ;;  %958 = vmatprep.mubr.f32.mxu1 %v1576_v20  ;;  %v745_v10 = vmax.f32 %v2056_v16, 0.0  ;;  %v761_v53 = vmax.f32 %v2064_v37, 0.0 }
 0x1c4   :  { %v1192_v43 = vadd.f32 %v1191_v3, %v1189_v19  ;;  %v1205_v45 = vadd.f32 %v1204_v18, %v1202_v27  ;;  %v762_v57 = vmax.f32 %v731_v42, 0.0  ;;  %v735_v28 = vadd.f32 %v734_v38, %v1860_v17 }
 0x1c5   :  { %v1175_v50 = vrot.slane %v1174_v35, 4  ;;  %v736_v51 = vpop.f32.mrf.mxu1  ;;  %v1049_v52 = vpop.f32.mrf.mxu0  ;;  %v1162_v33 = vrot.slane %v1161_v32, 4  ;;  %v1299_v62 = vmul.f32 %v1044_v46, %v2008_v36  ;;  %v1312_v4 = vmul.f32 %v1044_v46, %v1044_v46 }
 0x1c6   :  { %v1206_v55 = vrot.slane %v1205_v45, 4  ;;  %1490 = vmatmul.mubr.msk.f32.gmra.mxu1 %vm68_vm0, %v1942_v2  ;;  %v737_v60 = vadd.f32 %v736_v51, %v1860_v17  ;;  %v1050_v22 = vadd.f32 %v1049_v52, %v2020_v56  ;;  %v1046_v5 = vadd.f32 %v1045_v39, %v2002_v31 }
 0x1c7   :  { %v1176_v58 = vadd.f32 %v1175_v50, %v1174_v35  ;;  %v1051_v49 = vpop.f32.mrf.mxu0  ;;  %964 = vmatprep.mubr.f32.mxu1 %v1576_v20  ;;  %v1193_v7 = vrot.slane %v1192_v43, 4  ;;  %v769_v15 = vmax.f32 %v735_v28, 0.0  ;;  %v1163_v1 = vadd.f32 %v1162_v33, %v1161_v32 }
 0x1c8   :  { %v1207_v61 = vadd.f32 %v1206_v55, %v1205_v45  ;;  %v770_v8 = vmax.f32 %v737_v60, 0.0  ;;  %v1300_v9 = vmul.f32 %v1050_v22, %v2004_v30  ;;  %v1313_v17 = vmul.f32 %v1050_v22, %v1050_v22 }
 0x1c9   :  { %v1177_v6 = vrot.slane %v1176_v58, 2  ;;  %v1055_v11 = vpop.f32.mrf.mxu0  ;;  %v1052_v0 = vadd.f32 %v1051_v49, %v2020_v56  ;;  %v1337_v25 = vmul.f32 %v1046_v5, %v2008_v36  ;;  %v1350_v37 = vmul.f32 %v1046_v5, %v1046_v5 }
 0x1ca   :  { %v1208_v14 = vrot.slane %v1207_v61, 2  ;;  %1491 = vmatmul.mubr.msk.f32.gmra.mxu1 %vm68_vm0, %v1962_v13  ;;  %v1303_v18 = vadd.f32 %v1300_v9, %v1299_v62  ;;  %v1056_v21 = vadd.f32 %v1055_v11, %v2034_v12  ;;  %1090 = vmatprep.subr.mxu1 %v770_v8  ;;  %v1316_v42 = vadd.f32 %v1313_v17, %v1312_v4 }
 0x1cb   :  { %v1178_v3 = vadd.f32 %v1177_v6, %v1176_v58  ;;  %v1057_v23 = vpop.f32.mrf.mxu0  ;;  %v1338_v19 = vmul.f32 %v1052_v0, %v2004_v30  ;;  %1091 = vmatpush1.msra.mxu1 %v769_v15  ;;  %v1351_v35 = vmul.f32 %v1052_v0, %v1052_v0  ;;  %970 = vmatprep.mubr.f32.mxu1 %v1576_v20  ;;  %v746_v51 = vmax.f32 %v2073_v41, 0.0 }
 0x1cc   :  { %v1209_v24 = vadd.f32 %v1208_v14, %v1207_v61  ;;  %v1301_v38 = vmul.f32 %v1056_v21, %v2014_v44  ;;  %1092 = vmatprep.subr.mxu1 %v762_v57  ;;  %v1194_v39 = vadd.f32 %v1193_v7, %v1192_v43  ;;  %v1314_v50 = vmul.f32 %v1056_v21, %v1056_v21 }
 0x1cd   :  { %v1179_v27 = vrot.slane %v1178_v3, 1  ;;  %v1061_v32 = vpop.f32.mrf.mxu0  ;;  %v1341_v46 = vadd.f32 %v1338_v19, %v1337_v25  ;;  %1093 = vmatpush1.msra.mxu1 %v761_v53  ;;  %v753_v52 = vmax.f32 %v2078_v47, 0.0  ;;  %v1164_v58 = vrot.slane %v1163_v1, 2 }
 0x1ce   :  { %v1210_v45 = vrot.slane %v1209_v24, 1  ;;  %v1304_v28 = vadd.f32 %v1303_v18, %v1301_v38  ;;  %1492 = vmatmul.mubr.msk.f32.gmra.mxu1 %vm68_vm0, %v1977_v26  ;;  %v1354_v60 = vadd.f32 %v1351_v35, %v1350_v37  ;;  %v1058_v22 = vadd.f32 %v1057_v23, %v2034_v12  ;;  %1094 = vmatprep.subr.mxu1 %v754_v48 }
 0x1cf   :  { %v1180_v55 = vadd.f32 %v1179_v27, %v1178_v3  ;;  %v1063_v33 = vpop.f32.mrf.mxu0  ;;  %v1317_v49 = vadd.f32 %v1316_v42, %v1314_v50  ;;  %v1062_v53 = vadd.f32 %v1061_v32, %v2046_v54  ;;  %1095 = vmatpush1.msra.mxu1 %v753_v52  ;;  %1130 = vmatprep.mubr.f32.mxu1 %v1576_v20  ;;  %v1195_v47 = vrot.slane %v1194_v39, 2 }
 0x1d0   :  { %v1211_v57 = vadd.f32 %v1210_v45, %v1209_v24  ;;  %v1064_v41 = vadd.f32 %v1063_v33, %v2046_v54  ;;  %v1339_v62 = vmul.f32 %v1058_v22, %v2014_v44  ;;  %v1352_v4 = vmul.f32 %v1058_v22, %v1058_v22  ;;  %1096 = vmatprep.subr.mxu1 %v746_v51 }
 0x1d1   :  { %v1181_v43 = vmax.f32 %v1180_v55, 1e-24  ;;  %v1302_v5 = vmul.f32 %v1062_v53, %v2012_v40  ;;  %v1315_v6 = vmul.f32 %v1062_v53, %v1062_v53  ;;  %1097 = vmatpush1.msra.mxu1 %v745_v10  ;;  %v1165_v0 = vadd.f32 %v1164_v58, %v1163_v1 }
 0x1d2   :  { %v1212_v61 = vmax.f32 %v1211_v57, 1e-24  ;;  %v1340_v48 = vmul.f32 %v1064_v41, %v2012_v40  ;;  %v1342_v7 = vadd.f32 %v1341_v46, %v1339_v62  ;;  %v1355_v8 = vadd.f32 %v1354_v60, %v1352_v4  ;;  %1497 = vmatmul.mubr.msk.f32.vlgmr.msra.gmra.mxu1 %vm68_vm0, %v1919_v59 }
 0x1d3   :  { %1557 = vrsqrt.f32 %v1181_v43  ;;  %v1353_v9 = vmul.f32 %v1064_v41, %v1064_v41  ;;  %v1305_v11 = vadd.f32 %v1304_v28, %v1302_v5  ;;  %v1318_v14 = vadd.f32 %v1317_v49, %v1315_v6  ;;  %1136 = vmatprep.mubr.f32.mxu1 %v1576_v20 }
 0x1d4   :  { %1559 = vrsqrt.f32 %v1212_v61  ;;  %v1343_v15 = vadd.f32 %v1342_v7, %v1340_v48  ;;  %v1196_v16 = vadd.f32 %v1195_v47, %v1194_v39  ;;  %v1166_v21 = vrot.slane %v1165_v0, 1 }
 0x1d5   :  { %1561 = vrsqrt.f32 %v296_v29  ;;  %v1356_v17 = vadd.f32 %v1355_v8, %v1353_v9  ;;  %v1319_v3 = vrot.slane %v1318_v14, 4  ;;  %v1306_v24 = vrot.slane %v1305_v11, 4 }
 0x1d6   :  { %1498 = vmatmul.mubr.msk.f32.gmra.mxu1 %vm68_vm0, %v1942_v2  ;;  %v1197_v29 = vrot.slane %v1196_v16, 1  ;;  %v1344_v1 = vrot.slane %v1343_v15, 4  ;;  %v1167_v19 = vadd.f32 %v1166_v21, %v1165_v0 }
 0x1d7   :  { %v1357_v10 = vrot.slane %v1356_v17, 4  ;;  %v1320_v18 = vadd.f32 %v1319_v3, %v1318_v14  ;;  %1142 = vmatprep.mubr.f32.mxu1 %v1576_v20  ;;  %v1307_v39 = vadd.f32 %v1306_v24, %v1305_v11 }
 0x1d8   :  { %v1198_v42 = vadd.f32 %v1197_v29, %v1196_v16  ;;  %v1345_v50 = vadd.f32 %v1344_v1, %v1343_v15 }
 0x1d9   :  { %v1358_v59 = vadd.f32 %v1357_v10, %v1356_v17  ;;  %v1321_v63 = vrot.slane %v1320_v18, 2  ;;  %v1308_v58 = vrot.slane %v1307_v39, 2 }
 0x1da   :  { %1499 = vmatmul.mubr.msk.f32.gmra.mxu1 %vm68_vm0, %v1962_v13  ;;  %v1346_v60 = vrot.slane %v1345_v50, 2 }
 0x1db   :  { %v1359_v23 = vrot.slane %v1358_v59, 2  ;;  %v1322_v25 = vadd.f32 %v1321_v63, %v1320_v18  ;;  %1148 = vmatprep.mubr.f32.mxu1 %v1576_v20  ;;  %v2130_v20 = vld [vmem:[%s2211_s2] sm:$0xff]  ;;  %v1309_v49 = vadd.f32 %v1308_v58, %v1307_v39 }
 0x1dc   :  { %v1347_v53 = vadd.f32 %v1346_v60, %v1345_v50 }
 0x1dd   :  { %v1360_v37 = vadd.f32 %v1359_v23, %v1358_v59  ;;  %v1323_v27 = vrot.slane %v1322_v25, 1  ;;  %v1310_v47 = vrot.slane %v1309_v49, 1 }
 0x1de   :  { %1500 = vmatmul.mubr.msk.f32.gmra.mxu1 %vm68_vm0, %v1977_v26  ;;  %v1348_v61 = vrot.slane %v1347_v53, 1 }
 0x1df   :  { %v1361_v35 = vrot.slane %v1360_v37, 1  ;;  %v1324_v45 = vadd.f32 %v1323_v27, %v1322_v25  ;;  %v1311_v62 = vadd.f32 %v1310_v47, %v1309_v49 }
 0x1e0   :  { %v1558_v2 = vpop.eup %1557  ;;  %v1349_v5 = vadd.f32 %v1348_v61, %v1347_v53 }
 0x1e1   :  { %v1560_v38 = vpop.eup %1559  ;;  %v1183_v32 = vmul.f32 %v1558_v2, %v1167_v19  ;;  %v1362_v51 = vadd.f32 %v1361_v35, %v1360_v37  ;;  %v1325_v55 = vmax.f32 %v1324_v45, 1e-24 }
 0x1e2   :  { %v2125_v46 = vpop.eup %1561  ;;  %v1214_v13 = vmul.f32 %v1560_v38, %v1198_v42 }
 0x1e3   :  { %v1184_v52 = vmul.f32 %v2125_v46, %v1183_v32  ;;  %v1363_v26 = vmax.f32 %v1362_v51, 1e-24  ;;  %1563 = vrsqrt.f32 %v1325_v55 }
 0x1e4   :  { %v1215_v28 = vmul.f32 %v2125_v46, %v1214_v13 }
 0x1e5   :  { %v1185_v33 = vmul.f32 %v1184_v52, %v2130_v20  ;;  %1565 = vrsqrt.f32 %v1363_v26 }
 0x1e6   :  { %v1216_v57 = vmul.f32 %v1215_v28, %v2130_v20 }
 0x1e7   :  { %v1218_v22 = vrot.slane %v1185_v33, 7 }
 0x1e9   :  { %vm2136_vm2 = vcmp.gt.f32.partialorder %v1216_v57, %v1218_v22 }
 0x1ea   :  { %v2142_v41 = vsel %vm2136_vm2, %v1216_v57, %v1218_v22 }
 0x1f0   :  { %v1564_v4 = vpop.eup %1563 }
 0x1f1   :  { %v1327_v48 = vmul.f32 %v1564_v4, %v1311_v62 }
 0x1f2   :  { %v1566_v6 = vpop.eup %1565 }
 0x1f3   :  { %v1365_v7 = vmul.f32 %v1566_v6, %v1349_v5  ;;  %v2145_v8 = vmul.f32 %v2125_v46, %v1327_v48 }
 0x1f5   :  { %v2148_v9 = vmul.f32 %v2125_v46, %v1365_v7 }
 0x282   :  { %v954_v11 = vpop.f32.mrf.mxu1 }
 0x283   :  { %v955_v15 = vadd.f32 %v954_v11, %v2002_v31 }
 0x284   :  { %v956_v14 = vpop.f32.mrf.mxu1 }
 0x285   :  { %v957_v0 = vadd.f32 %v956_v14, %v2002_v31  ;;  %v1223_v10 = vmul.f32 %v955_v15, %v2008_v36  ;;  %v1236_v2 = vmul.f32 %v955_v15, %v955_v15 }
 0x286   :  { %v960_v17 = vpop.f32.mrf.mxu1 }
 0x287   :  { %v961_v3 = vadd.f32 %v960_v17, %v2020_v56  ;;  %v1261_v63 = vmul.f32 %v957_v0, %v2008_v36  ;;  %v1274_v38 = vmul.f32 %v957_v0, %v957_v0 }
 0x288   :  { %v962_v16 = vpop.f32.mrf.mxu1 }
 0x289   :  { %v1224_v18 = vmul.f32 %v961_v3, %v2004_v30  ;;  %v963_v59 = vadd.f32 %v962_v16, %v2020_v56  ;;  %v1237_v24 = vmul.f32 %v961_v3, %v961_v3 }
 0x28a   :  { %v966_v21 = vpop.f32.mrf.mxu1 }
 0x28b   :  { %v1227_v29 = vadd.f32 %v1224_v18, %v1223_v10  ;;  %v1262_v23 = vmul.f32 %v963_v59, %v2004_v30  ;;  %v967_v25 = vadd.f32 %v966_v21, %v2034_v12  ;;  %v1275_v19 = vmul.f32 %v963_v59, %v963_v59 }
 0x28c   :  { %v968_v1 = vpop.f32.mrf.mxu1  ;;  %v1240_v13 = vadd.f32 %v1237_v24, %v1236_v2 }
 0x28d   :  { %v1265_v37 = vadd.f32 %v1262_v23, %v1261_v63  ;;  %v969_v27 = vadd.f32 %v968_v1, %v2034_v12  ;;  %v1225_v42 = vmul.f32 %v967_v25, %v2014_v44  ;;  %v1238_v35 = vmul.f32 %v967_v25, %v967_v25 }
 0x28e   :  { %v972_v45 = vpop.f32.mrf.mxu1  ;;  %v1278_v52 = vadd.f32 %v1275_v19, %v1274_v38 }
 0x28f   :  { %v1263_v32 = vmul.f32 %v969_v27, %v2014_v44  ;;  %v1276_v39 = vmul.f32 %v969_v27, %v969_v27  ;;  %v1228_v50 = vadd.f32 %v1227_v29, %v1225_v42  ;;  %v973_v51 = vadd.f32 %v972_v45, %v2046_v54 }
 0x290   :  { %v974_v28 = vpop.f32.mrf.mxu1  ;;  %v1241_v26 = vadd.f32 %v1240_v13, %v1238_v35 }
 0x291   :  { %v1266_v55 = vadd.f32 %v1265_v37, %v1263_v32  ;;  %v1226_v33 = vmul.f32 %v973_v51, %v2012_v40  ;;  %v1239_v58 = vmul.f32 %v973_v51, %v973_v51  ;;  %v975_v57 = vadd.f32 %v974_v28, %v2046_v54 }
 0x292   :  { %v1279_v60 = vadd.f32 %v1278_v52, %v1276_v39  ;;  %v1132_v61 = vpop.f32.mrf.mxu1 }
 0x293   :  { %v1229_v22 = vadd.f32 %v1228_v50, %v1226_v33  ;;  %v1242_v49 = vadd.f32 %v1241_v26, %v1239_v58  ;;  %v1264_v53 = vmul.f32 %v975_v57, %v2012_v40  ;;  %v1277_v47 = vmul.f32 %v975_v57, %v975_v57 }
 0x294   :  { %v1134_v6 = vpop.f32.mrf.mxu1  ;;  %v1133_v48 = vadd.f32 %v1132_v61, %v2002_v31 }
 0x295   :  { %v1243_v62 = vrot.slane %v1242_v49, 4  ;;  %v1267_v4 = vadd.f32 %v1266_v55, %v1264_v53  ;;  %v1280_v5 = vadd.f32 %v1279_v60, %v1277_v47  ;;  %v1230_v7 = vrot.slane %v1229_v22, 4 }
 0x296   :  { %v1138_v15 = vpop.f32.mrf.mxu1  ;;  %v1135_v17 = vadd.f32 %v1134_v6, %v2002_v31  ;;  %v1375_v18 = vmul.f32 %v1133_v48, %v2008_v36  ;;  %v1388_v42 = vmul.f32 %v1133_v48, %v1133_v48 }
 0x297   :  { %v1244_v11 = vadd.f32 %v1243_v62, %v1242_v49  ;;  %v1281_v14 = vrot.slane %v1280_v5, 4  ;;  %v1139_v0 = vadd.f32 %v1138_v15, %v2020_v56  ;;  %v1231_v63 = vadd.f32 %v1230_v7, %v1229_v22 }
 0x298   :  { %v1140_v10 = vpop.f32.mrf.mxu1  ;;  %v1413_v1 = vmul.f32 %v1135_v17, %v2008_v36  ;;  %v1268_v27 = vrot.slane %v1267_v4, 4  ;;  %v1426_v38 = vmul.f32 %v1135_v17, %v1135_v17 }
 0x299   :  { %v1245_v3 = vrot.slane %v1244_v11, 2  ;;  %v1282_v16 = vadd.f32 %v1281_v14, %v1280_v5  ;;  %v1376_v59 = vmul.f32 %v1139_v0, %v2004_v30  ;;  %v1141_v21 = vadd.f32 %v1140_v10, %v2020_v56 }
 0x29a   :  { %v1389_v24 = vmul.f32 %v1139_v0, %v1139_v0  ;;  %v1144_v25 = vpop.f32.mrf.mxu1  ;;  %v1232_v45 = vrot.slane %v1231_v63, 2  ;;  %v1269_v33 = vadd.f32 %v1268_v27, %v1267_v4 }
 0x29b   :  { %v1246_v29 = vadd.f32 %v1245_v3, %v1244_v11  ;;  %v1283_v23 = vrot.slane %v1282_v16, 2  ;;  %v1379_v37 = vadd.f32 %v1376_v59, %v1375_v18  ;;  %v1414_v31 = vmul.f32 %v1141_v21, %v2004_v30 }
 0x29c   :  { %v1146_v35 = vpop.f32.mrf.mxu1  ;;  %v1145_v39 = vadd.f32 %v1144_v25, %v2034_v12  ;;  %v1392_v51 = vadd.f32 %v1389_v24, %v1388_v42  ;;  %v1427_v36 = vmul.f32 %v1141_v21, %v1141_v21  ;;  %v1270_v48 = vrot.slane %v1269_v33, 2 }
 0x29d   :  { %v1247_v19 = vrot.slane %v1246_v29, 1  ;;  %v1284_v2 = vadd.f32 %v1283_v23, %v1282_v16  ;;  %v1417_v32 = vadd.f32 %v1414_v31, %v1413_v1  ;;  %v1147_v56 = vadd.f32 %v1146_v35, %v2034_v12 }
 0x29e   :  { %v1150_v52 = vpop.f32.mrf.mxu1  ;;  %v1377_v55 = vmul.f32 %v1145_v39, %v2014_v44  ;;  %v1390_v30 = vmul.f32 %v1145_v39, %v1145_v39  ;;  %v1430_v5 = vadd.f32 %v1427_v36, %v1426_v38  ;;  %v1233_v15 = vadd.f32 %v1232_v45, %v1231_v63 }
 0x29f   :  { %v1248_v13 = vadd.f32 %v1247_v19, %v1246_v29  ;;  %v1285_v50 = vrot.slane %v1284_v2, 1  ;;  %v1415_v28 = vmul.f32 %v1147_v56, %v2014_v44  ;;  %v1151_v57 = vadd.f32 %v1150_v52, %v2046_v54 }
 0x2a0   :  { %v1152_v60 = vpop.f32.mrf.mxu1  ;;  %v1380_v22 = vadd.f32 %v1379_v37, %v1377_v55  ;;  %v1393_v49 = vadd.f32 %v1392_v51, %v1390_v30  ;;  %v1428_v53 = vmul.f32 %v1147_v56, %v1147_v56  ;;  %v1271_v16 = vadd.f32 %v1270_v48, %v1269_v33 }
 0x2a1   :  { %v1249_v26 = vmax.f32 %v1248_v13, 1e-24  ;;  %v1286_v58 = vadd.f32 %v1285_v50, %v1284_v2  ;;  %v1418_v12 = vadd.f32 %v1417_v32, %v1415_v28  ;;  %v1378_v61 = vmul.f32 %v1151_v57, %v2012_v40 }
 0x2a2   :  { %v1391_v62 = vmul.f32 %v1151_v57, %v1151_v57  ;;  %v1153_v6 = vadd.f32 %v1152_v60, %v2046_v54  ;;  %v1431_v7 = vadd.f32 %v1430_v5, %v1428_v53  ;;  %v1234_v59 = vrot.slane %v1233_v15, 1 }
 0x2a3   :  { %1567 = vrsqrt.f32 %v1249_v26  ;;  %v1287_v47 = vmax.f32 %v1286_v58, 1e-24  ;;  %v1381_v44 = vadd.f32 %v1380_v22, %v1378_v61  ;;  %v1272_v23 = vrot.slane %v1271_v16, 1 }
 0x2a4   :  { %v1394_v4 = vadd.f32 %v1393_v49, %v1391_v62  ;;  %v1416_v11 = vmul.f32 %v1153_v6, %v2012_v40  ;;  %v1429_v14 = vmul.f32 %v1153_v6, %v1153_v6  ;;  %v1235_v1 = vadd.f32 %v1234_v59, %v1233_v15 }
 0x2a5   :  { %1569 = vrsqrt.f32 %v1287_v47  ;;  %v1382_v54 = vrot.slane %v1381_v44, 4  ;;  %v1273_v63 = vadd.f32 %v1272_v23, %v1271_v16  ;;  %v1222_v32 = vsel %vm2136_vm2, 1, %v1577_v34 }
 0x2a6   :  { %v1395_v17 = vrot.slane %v1394_v4, 4  ;;  %v1419_v0 = vadd.f32 %v1418_v12, %v1416_v11  ;;  %v1432_v3 = vadd.f32 %v1431_v7, %v1429_v14  ;;  %v1255_v13 = vrot.slane %v2142_v41, 7 }
 0x2a7   :  { %v1383_v2 = vadd.f32 %v1382_v54, %v1381_v44  ;;  %v1259_v30 = vrot.slane %v1222_v32, 7  ;;  %v1329_v12 = vmul.f32 %v2145_v8, %v2130_v20  ;;  %v1367_v48 = vmul.f32 %v2148_v9, %v2130_v20 }
 0x2a8   :  { %v1396_v10 = vadd.f32 %v1395_v17, %v1394_v4  ;;  %v1433_v18 = vrot.slane %v1432_v3, 4  ;;  %v1420_v19 = vrot.slane %v1419_v0, 4 }
 0x2a9   :  { %v1384_v55 = vrot.slane %v1383_v2, 2 }
 0x2aa   :  { %v1397_v21 = vrot.slane %v1396_v10, 2  ;;  %v1434_v29 = vadd.f32 %v1433_v18, %v1432_v3  ;;  %v1421_v50 = vadd.f32 %v1420_v19, %v1419_v0 }
 0x2ab   :  { %v1385_v41 = vadd.f32 %v1384_v55, %v1383_v2 }
 0x2ac   :  { %v1398_v24 = vadd.f32 %v1397_v21, %v1396_v10  ;;  %v1435_v25 = vrot.slane %v1434_v29, 2  ;;  %v1422_v34 = vrot.slane %v1421_v50, 2 }
 0x2ad   :  { %v1386_v61 = vrot.slane %v1385_v41, 1 }
 0x2ae   :  { %v1399_v37 = vrot.slane %v1398_v24, 1  ;;  %v1436_v40 = vadd.f32 %v1435_v25, %v1434_v29  ;;  %v1423_v49 = vadd.f32 %v1422_v34, %v1421_v50 }
 0x2af   :  { %v1387_v7 = vadd.f32 %v1386_v61, %v1385_v41 }
 0x2b0   :  { %v1568_v31 = vpop.eup %1567  ;;  %v1400_v42 = vadd.f32 %v1399_v37, %v1398_v24  ;;  %v1437_v38 = vrot.slane %v1436_v40, 1  ;;  %v1424_v6 = vrot.slane %v1423_v49, 1 }
 0x2b1   :  { %v1251_v27 = vmul.f32 %v1568_v31, %v1235_v1 }
 0x2b2   :  { %v1570_v35 = vpop.eup %1569  ;;  %v1401_v45 = vmax.f32 %v1400_v42, 1e-24  ;;  %v1438_v51 = vadd.f32 %v1437_v38, %v1436_v40  ;;  %v1425_v0 = vadd.f32 %v1424_v6, %v1423_v49 }
 0x2b3   :  { %v1252_v39 = vmul.f32 %v2125_v46, %v1251_v27  ;;  %v1289_v56 = vmul.f32 %v1570_v35, %v1273_v63 }
 0x2b4   :  { %1571 = vrsqrt.f32 %v1401_v45  ;;  %v1439_v28 = vmax.f32 %v1438_v51, 1e-24 }
 0x2b5   :  { %v1253_v52 = vmul.f32 %v1252_v39, %v2130_v20  ;;  %v1290_v36 = vmul.f32 %v2125_v46, %v1289_v56 }
 0x2b6   :  { %1573 = vrsqrt.f32 %v1439_v28 }
 0x2b7   :  { %vm1257_vm3 = vcmp.gt.f32.partialorder %v1253_v52, %v1255_v13  ;;  %v1291_v58 = vmul.f32 %v1290_v36, %v2130_v20 }
 0x2b8   :  { %v1260_v26 = vsel %vm1257_vm3, 2, %v1259_v30  ;;  %v1258_v43 = vsel %vm1257_vm3, %v1253_v52, %v1255_v13 }
 0x2b9   :  { %v1297_v33 = vrot.slane %v1260_v26, 7  ;;  %v1293_v57 = vrot.slane %v1258_v43, 7 }
 0x2bb   :  { %vm1295_vm4 = vcmp.gt.f32.partialorder %v1291_v58, %v1293_v57 }
 0x2bc   :  { %v1296_v60 = vsel %vm1295_vm4, %v1291_v58, %v1293_v57  ;;  %v1298_v22 = vsel %vm1295_vm4, 3, %v1297_v33 }
 0x2bd   :  { %v1331_v53 = vrot.slane %v1296_v60, 7  ;;  %v1335_v47 = vrot.slane %v1298_v22, 7 }
 0x2bf   :  { %vm1333_vm5 = vcmp.gt.f32.partialorder %v1329_v12, %v1331_v53 }
 0x2c0   :  { %v1336_v62 = vsel %vm1333_vm5, 4, %v1335_v47  ;;  %v1334_v5 = vsel %vm1333_vm5, %v1329_v12, %v1331_v53 }
 0x2c1   :  { %v1373_v44 = vrot.slane %v1336_v62, 7  ;;  %v1369_v4 = vrot.slane %v1334_v5, 7  ;;  %v1572_v11 = vpop.eup %1571 }
 0x2c2   :  { %v1403_v14 = vmul.f32 %v1572_v11, %v1387_v7 }
 0x2c3   :  { %vm1371_vm6 = vcmp.gt.f32.partialorder %v1367_v48, %v1369_v4  ;;  %v1574_v8 = vpop.eup %1573 }
 0x2c4   :  { %v1372_v15 = vsel %vm1371_vm6, %v1367_v48, %v1369_v4  ;;  %v1374_v17 = vsel %vm1371_vm6, 5, %v1373_v44  ;;  %v1404_v3 = vmul.f32 %v2125_v46, %v1403_v14  ;;  %v1441_v18 = vmul.f32 %v1574_v8, %v1425_v0 }
 0x2c5   :  { %v1407_v16 = vrot.slane %v1372_v15, 7  ;;  %v1411_v10 = vrot.slane %v1374_v17, 7 }
 0x2c6   :  { %v1405_v59 = vmul.f32 %v1404_v3, %v2130_v20  ;;  %v1442_v21 = vmul.f32 %v2125_v46, %v1441_v18 }
 0x2c8   :  { %vm1409_vm7 = vcmp.gt.f32.partialorder %v1405_v59, %v1407_v16  ;;  %v1443_v54 = vmul.f32 %v1442_v21, %v2130_v20 }
 0x2c9   :  { %v1412_v9 = vsel %vm1409_vm7, 6, %v1411_v10  ;;  %v1410_v29 = vsel %vm1409_vm7, %v1405_v59, %v1407_v16 }
 0x2ca   :  { %v1449_v23 = vrot.slane %v1412_v9, 7  ;;  %v1445_v24 = vrot.slane %v1410_v29, 7 }
 0x2cc   :  { %vm1447_vm8 = vcmp.gt.f32.partialorder %v1443_v54, %v1445_v24 }
 0x2cd   :  { %v1448_v25 = vsel %vm1447_vm8, %v1443_v54, %v1445_v24  ;;  %v1450_v1 = vsel %vm1447_vm8, 7, %v1449_v23 }
 0x2ce   :  { %1451 = vst [vmem:[%s2212_s8 - $0x7] sm:$0x80] %v1448_v25  ;;  %1452 = vst [vmem:[%s2213_s9 - $0x7] sm:$0x80] %v1450_v1 }

</bundles_post_ra>
